<compile_context>
chip_gen: v6e
topology: v6e:2x2x1
jax: 0.10.0
libtpu: 0.0.40
codegen_flags: <defaults>
</compile_context>

<pallas_src>
import functools
import math

import numpy as np
import jax
import jax.numpy as jnp
from jax.experimental import pallas as pl
from jax.experimental.pallas import tpu as pltpu

# ----------------------------- model config ---------------------------------
CONV_LAYERS = 8          # conv_layers
Z_DIM = 16               # z_dimension
KSIZE = 4                # conv_kernel_size (output layer uses KSIZE - 3 = 1)
IN_CH = 3                # input_channels
H = W = 16               # height, width
HIDDEN = 32              # hidden_dim
BATCH = 2

BN_EPS = 1e-5
LRELU_SLOPE = 0.1        # matches nn.LeakyReLU(0.1) in the module
BN_EVAL_SCALE = 1.0 / math.sqrt(1.0 + BN_EPS)   # eval BN, default running stats
# TODO(synk): if trained running stats / affine BN params are ever loaded, the
# fold must become ((x@w + b) - mean) * gamma/sqrt(var+eps) + beta.

ROW_ALIGN = 16           # bf16 sublane tile -> every packed block is aligned
WBUF_LANES = 128         # packed weight-buffer width (max GEMM N = 128)
LBUF_LANES = 32          # packed row-selection buffer width


def _round_up(n, m):
    return ((n + m - 1) // m) * m


# ----------------------------- parameters ------------------------------------
def _xavier_uniform(key, shape):
    if len(shape) == 2:
        fan_out, fan_in = shape
    else:
        recep = shape[2] * shape[3]
        fan_in = shape[1] * recep
        fan_out = shape[0] * recep
    bound = math.sqrt(6.0 / (fan_in + fan_out))
    return jax.random.uniform(key, shape, jnp.float32, -bound, bound)


def init_params(key):
    keys = iter(jax.random.split(key, 40))
    C = CONV_LAYERS
    h16, w16 = H // 16, W // 16
    flat = h16 * w16 * C * 2

    def w(shape):
        return _xavier_uniform(next(keys), shape)

    def b(n, fan_in):
        bound = 1.0 / math.sqrt(fan_in)
        return jax.random.uniform(next(keys), (n,), jnp.float32, -bound, bound)

    p = {}
    # encoder convs: weight (O, I, k, k) as in PyTorch nn.Conv2d
    p["conv1_w"] = w((C, IN_CH, KSIZE, KSIZE)); p["conv1_b"] = b(C, IN_CH * KSIZE * KSIZE)
    p["conv2_w"] = w((C, C, KSIZE, KSIZE));     p["conv2_b"] = b(C, C * KSIZE * KSIZE)
    p["conv3_w"] = w((2 * C, C, KSIZE, KSIZE)); p["conv3_b"] = b(2 * C, C * KSIZE * KSIZE)
    p["conv4_w"] = w((2 * C, 2 * C, KSIZE, KSIZE)); p["conv4_b"] = b(2 * C, 2 * C * KSIZE * KSIZE)
    # linears: weight (out, in) as in PyTorch
    p["linear1_w"] = w((HIDDEN, flat));  p["linear1_b"] = b(HIDDEN, flat)
    p["latent_mu_w"] = w((Z_DIM, HIDDEN)); p["latent_mu_b"] = b(Z_DIM, HIDDEN)
    p["latent_logvar_w"] = w((Z_DIM, HIDDEN)); p["latent_logvar_b"] = b(Z_DIM, HIDDEN)
    p["lin1d_w"] = w((HIDDEN, Z_DIM)); p["lin1d_b"] = b(HIDDEN, Z_DIM)
    p["lin_w"] = w((flat, HIDDEN));    p["lin_b"] = b(flat, HIDDEN)
    # decoder transposed convs: weight (I, O, k, k) as in PyTorch nn.ConvTranspose2d
    p["conv5_w"] = w((2 * C, 2 * C, KSIZE, KSIZE)); p["conv5_b"] = b(2 * C, 2 * C * KSIZE * KSIZE)
    p["conv6_w"] = w((2 * C, 2 * C, KSIZE, KSIZE)); p["conv6_b"] = b(2 * C, 2 * C * KSIZE * KSIZE)
    p["conv7_w"] = w((2 * C, C, KSIZE, KSIZE));     p["conv7_b"] = b(C, C * KSIZE * KSIZE)
    p["conv8_w"] = w((C, C, KSIZE, KSIZE));         p["conv8_b"] = b(C, C * KSIZE * KSIZE)
    ok = KSIZE - 3
    p["output_w"] = w((C, IN_CH, ok, ok)); p["output_b"] = b(IN_CH, IN_CH * ok * ok)
    return p


# ----------------------- init-time layer factorisation -----------------------
class _RowPacker:
    """Packs 2-D blocks row-wise into one (rows, width) buffer."""

    def __init__(self, width):
        self.width = width
        self.blocks = []
        self.off = 0

    def add(self, mat):
        mat = np.asarray(mat, np.float32)
        r, c = mat.shape
        assert c <= self.width, (c, self.width)
        blk = np.zeros((r, self.width), np.float32)
        blk[:, :c] = mat
        off = self.off
        self.blocks.append(blk)
        self.off += r
        return off

    def finalize(self, dtype):
        buf = np.concatenate(self.blocks, axis=0)
        pad = _round_up(buf.shape[0], ROW_ALIGN) - buf.shape[0]
        if pad:
            buf = np.concatenate([buf, np.zeros((pad, self.width), np.float32)], 0)
        return jnp.asarray(buf, dtype)


def _conv_factors(weight, h_in, w_in, batch, stride, pad, transposed):
    """Factor a (transposed) conv into per-kh (L_t, R_t) such that
    out = sum_t L_t @ A @ R_t in the (batch*h, w*chan) activation layout."""
    weight = np.asarray(weight, np.float32)
    if transposed:
        c_in, c_out, kh, kw_sz = weight.shape
        h_out = (h_in - 1) * stride - 2 * pad + kh     # output_padding = 0
        w_out = (w_in - 1) * stride - 2 * pad + kw_sz
    else:
        c_out, c_in, kh, kw_sz = weight.shape
        h_out = (h_in + 2 * pad - kh) // stride + 1
        w_out = (w_in + 2 * pad - kw_sz) // stride + 1
    rin_p = _round_up(batch * h_in, ROW_ALIGN)
    rout_p = _round_up(batch * h_out, ROW_ALIGN)
    Ls, Rs = [], []
    for t in range(kh):
        L = np.zeros((rout_p, rin_p), np.float32)
        for b in range(batch):
            for ho in range(h_out):
                if transposed:
                    num = ho + pad - t
                    if num % stride:
                        continue
                    hi = num // stride
                else:
                    hi = stride * ho - pad + t
                if 0 <= hi < h_in:
                    L[b * h_out + ho, b * h_in + hi] = 1.0
        R = np.zeros((w_in * c_in, w_out * c_out), np.float32)
        for wo in range(w_out):
            for wi in range(w_in):
                kw = (wo + pad - stride * wi) if transposed else (wi - stride * wo + pad)
                if 0 <= kw < kw_sz:
                    blk = weight[:, :, t, kw] if transposed else weight[:, :, t, kw].T
                    R[wi * c_in:(wi + 1) * c_in, wo * c_out:(wo + 1) * c_out] = blk
        Ls.append(L)
        Rs.append(R)
    return Ls, Rs, h_out, w_out, c_out, rin_p, rout_p


def build_plan(params):
    """Pre-pack every layer's GEMM-ready constants (BN folded) + static plan."""
    wpack = _RowPacker(WBUF_LANES)
    lpack = _RowPacker(LBUF_LANES)
    bias_rows = []
    plan = {}

    def add_bias(vec):
        vec = np.asarray(vec, np.float32)
        row = np.zeros((WBUF_LANES,), np.float32)
        row[:vec.shape[0]] = vec
        bias_rows.append(row)
        return len(bias_rows) - 1

    def add_conv(name, wk, bk, h_in, w_in, stride, pad, transposed, bn, act,
                 pack_l=True, n_gemm=None):
        Ls, Rs, h_out, w_out, c_out, rin_p, rout_p = _conv_factors(
            params[wk], h_in, w_in, BATCH, stride, pad, transposed)
        scale = BN_EVAL_SCALE if bn else 1.0
        k, n = Rs[0].shape
        w_off = wpack.off
        for R in Rs:                       # R_0..R_{kh-1} packed contiguously
            wpack.add(R * scale)
        use_l = pack_l and not (len(Ls) == 1
                                and np.array_equal(Ls[0], np.eye(rout_p, rin_p)))
        l_off = lpack.off if use_l else None
        if use_l:
            for L in Ls:
                lpack.add(L)
        bias = np.tile(np.asarray(params[bk], np.float32) * scale, w_out)
        plan[name] = dict(taps=len(Rs), k=k, k_total=len(Rs) * k,
                          n_gemm=(n_gemm if n_gemm is not None else n),
                          w_off=w_off, l_off=l_off, rin_p=rin_p, rout_p=rout_p,
                          b_idx=add_bias(bias), act=act)
        return h_out, w_out

    def add_linear(name, w_oi, bvec, bn, act):
        w_oi = np.asarray(w_oi, np.float32)            # (out, in) torch layout
        n_out, k_in = w_oi.shape
        scale = BN_EVAL_SCALE if bn else 1.0
        w_off = wpack.add(w_oi.T * scale)              # GEMM-ready (in, out)
        plan[name] = dict(taps=1, k=k_in, k_total=k_in, n_gemm=n_out,
                          w_off=w_off, l_off=None, rin_p=None, rout_p=None,
                          b_idx=add_bias(np.asarray(bvec, np.float32) * scale),
                          act=act)

    hh, ww = H, W
    hh, ww = add_conv("conv1", "conv1_w", "conv1_b", hh, ww, 2, 1, False, True,
                      "lrelu", pack_l=False)      # H-selection done in wrapper
    hh, ww = add_conv("conv2", "conv2_w", "conv2_b", hh, ww, 2, 1, False, True, "lrelu")
    hh, ww = add_conv("conv3", "conv3_w", "conv3_b", hh, ww, 2, 1, False, True, "lrelu")
    hh, ww = add_conv("conv4", "conv4_w", "conv4_b", hh, ww, 2, 1, False, True, "lrelu")
    add_linear("linear1", params["linear1_w"], params["linear1_b"], True, "lrelu")
    # latent_mu and latent_logvar fused into ONE GEMM (N = 2*Z_DIM)
    add_linear("latent",
               np.concatenate([np.asarray(params["latent_mu_w"], np.float32),
                               np.asarray(params["latent_logvar_w"], np.float32)], 0),
               np.concatenate([np.asarray(params["latent_mu_b"], np.float32),
                               np.asarray(params["latent_logvar_b"], np.float32)], 0),
               False, "none")
    add_linear("lin1d", params["lin1d_w"], params["lin1d_b"], False, "lrelu")
    add_linear("lin", params["lin_w"], params["lin_b"], False, "lrelu")
    hh, ww = H // 16, W // 16
    hh, ww = add_conv("conv5", "conv5_w", "conv5_b", hh, ww, 2, 1, True, False, "lrelu")
    hh, ww = add_conv("conv6", "conv6_w", "conv6_b", hh, ww, 2, 1, True, False, "lrelu")
    hh, ww = add_conv("conv7", "conv7_w", "conv7_b", hh, ww, 2, 1, True, False, "lrelu")
    hh, ww = add_conv("conv8", "conv8_w", "conv8_b", hh, ww, 2, 1, True, False, "lrelu")
    add_conv("output", "output_w", "output_b", hh, ww, 1, 0, True, False,
             "sigmoid", n_gemm=WBUF_LANES)        # 128-lane slab -> unmasked store

    bbuf = np.zeros((_round_up(len(bias_rows), 8), WBUF_LANES), np.float32)
    bbuf[:len(bias_rows)] = np.stack(bias_rows, 0)
    buffers = dict(
        wbuf=wpack.finalize(jnp.bfloat16),   # packed Toeplitz / linear weights
        lbuf=lpack.finalize(jnp.bfloat16),   # packed 0/1 row-selection matrices
        bbuf=jnp.asarray(bbuf, jnp.float32), # packed pre-broadcast biases
    )
    return plan, buffers


# ----------------------------- fused Pallas kernel ----------------------------
def _vae_kernel(x_ref, w_ref, l_ref, b_ref, out_ref, mulv_ref, *, plan):
    bias_all = b_ref[...]                                   # (rows, 128) f32, tiny

    def gemm(name, lhs):
        """ONE K-deep MXU GEMM for this layer + f32 bias / activation epilogue."""
        lyr = plan[name]
        assert lhs.shape[-1] == lyr["k_total"], (name, lhs.shape, lyr["k_total"])
        rhs = w_ref[lyr["w_off"]: lyr["w_off"] + lyr["k_total"], 0:lyr["n_gemm"]]
        acc = jnp.dot(lhs.astype(jnp.bfloat16), rhs,
                      preferred_element_type=jnp.float32)
        acc = acc + bias_all[lyr["b_idx"]: lyr["b_idx"] + 1, 0:lyr["n_gemm"]]
        if lyr["act"] == "lrelu":
            acc = jnp.where(acc > 0, acc, LRELU_SLOPE * acc)
        elif lyr["act"] == "sigmoid":
            acc = jax.nn.sigmoid(acc)
        return acc

    def conv(name, act):
        """(Transposed) conv: 4 tiny 0/1 row-selection dots -> lane-concat im2col
        LHS -> one K-deep GEMM (tap accumulation happens inside the MXU)."""
        lyr = plan[name]
        if lyr["l_off"] is None:                            # pre-selected / 1x1
            return gemm(name, act)
        a16 = act.astype(jnp.bfloat16)                      # one cast per layer
        rout_p, rin_p = lyr["rout_p"], lyr["rin_p"]
        assert act.shape[0] == rin_p and act.shape[1] == lyr["k"], (name, act.shape)
        blocks = []
        for t in range(lyr["taps"]):                        # static unroll, independent dots
            l_t = l_ref[lyr["l_off"] + t * rout_p:
                        lyr["l_off"] + (t + 1) * rout_p, 0:rin_p]
            blocks.append(jnp.dot(l_t, a16, preferred_element_type=jnp.float32))
        return gemm(name, jnp.concatenate(blocks, axis=1))  # (rout_p, taps*k)

    # ---- encode ----
    a = conv("conv1", x_ref[...])                           # wrapper-built im2col LHS
    a = conv("conv2", a)
    a = conv("conv3", a)
    a = conv("conv4", a)
    hid = gemm("linear1", a)                                # rows 0..B-1 valid
    mulv = gemm("latent", hid)                              # [:, :Z]=mu, [:, Z:]=logvar
    mulv_ref[...] = mulv[0:BATCH, 0:2 * Z_DIM]

    # ---- reparameterize (eval mode) ----
    # TODO(synk): training-mode path would add eps * exp(0.5*logvar) via
    # pltpu.prng_random_bits; eval mode returns mu (matches module.eval()).
    z = mulv[:, 0:Z_DIM]

    # ---- decode ----
    # TODO(synk): the reference torch.cat([z, skip], dim=0) skip connections are
    # shape-inconsistent in the PyTorch module (channel mismatch always errors),
    # so they are omitted here, as in the original port.
    # NOTE invariant: rows >= BATCH*h of the linear outputs carry lrelu(bias)
    # garbage; every conv layer's L selection only reads the valid rows.
    d = gemm("lin1d", z)
    d = gemm("lin", d)
    d = conv("conv5", d)
    d = conv("conv6", d)
    d = conv("conv7", d)
    d = conv("conv8", d)
    out_ref[...] = conv("output", d)                        # (B*H, 128); [:, :W*C] valid


def vae_forward(plan, buffers, x_nchw):
    b = x_nchw.shape[0]
    assert b == BATCH
    h1 = H // 2
    # Build conv1's H-direction im2col LHS in XLA (tiny, outside the kernel):
    # row (b*8 + ho), lane-block t = zero-padded input row (2*ho - 1 + t) with
    # (W, C) flattened to lanes -> matches the packed Toeplitz R_t row order.
    x_nhwc = jnp.transpose(x_nchw, (0, 2, 3, 1)).astype(jnp.float32)
    xpad = jnp.pad(x_nhwc, ((0, 0), (1, 1), (0, 0), (0, 0)))
    taps = [xpad[:, t:t + 2 * h1:2].reshape(b, h1, W * IN_CH) for t in range(KSIZE)]
    lhs1 = jnp.concatenate(taps, axis=-1).reshape(b * h1, KSIZE * W * IN_CH)
    lhs1 = lhs1.astype(jnp.bfloat16)                        # bf16 MXU operand

    wbuf, lbuf, bbuf = buffers["wbuf"], buffers["lbuf"], buffers["bbuf"]
    vmem = pl.BlockSpec(memory_space=pltpu.MemorySpace.VMEM)
    out2d, mulv = pl.pallas_call(
        functools.partial(_vae_kernel, plan=plan),
        out_shape=(
            jax.ShapeDtypeStruct((b * H, WBUF_LANES), jnp.float32),
            jax.ShapeDtypeStruct((b, 2 * Z_DIM), jnp.float32),
        ),
        in_specs=[vmem, vmem, vmem, vmem],                  # no grid, no pipelining
        out_specs=(vmem, vmem),
    )(lhs1, wbuf, lbuf, bbuf)

    out = jnp.transpose(out2d[:, 0:W * IN_CH].reshape(b, H, W, IN_CH), (0, 3, 1, 2))
    mu = mulv[:, 0:Z_DIM]
    logvar = mulv[:, Z_DIM:]
    z = mu
    return out, mu, logvar, z


# ------------------------- pure-JAX reference (validation) --------------------
def _leaky(x):
    return jnp.where(x > 0, x, LRELU_SLOPE * x)


def _ref_conv(x, w, b, stride, pad):
    y = jax.lax.conv_general_dilated(
        x, w, window_strides=(stride, stride),
        padding=((pad, pad), (pad, pad)),
        dimension_numbers=("NCHW", "OIHW", "NCHW"),
        precision=jax.lax.Precision.HIGHEST)
    return y + b.reshape(1, -1, 1, 1)


def _ref_deconv(x, w, b, stride, pad):
    k = w.shape[2]
    w_conv = jnp.transpose(jnp.flip(w, (2, 3)), (1, 0, 2, 3))     # (O, I, k, k)
    y = jax.lax.conv_general_dilated(
        x, w_conv, window_strides=(1, 1),
        padding=((k - 1 - pad,) * 2, (k - 1 - pad,) * 2),
        lhs_dilation=(stride, stride),
        dimension_numbers=("NCHW", "OIHW", "NCHW"),
        precision=jax.lax.Precision.HIGHEST)
    return y + b.reshape(1, -1, 1, 1)


def vae_reference(params, x):
    s = BN_EVAL_SCALE
    bsz = x.shape[0]
    a = _leaky(_ref_conv(x, params["conv1_w"], params["conv1_b"], 2, 1) * s)
    a = _leaky(_ref_conv(a, params["conv2_w"], params["conv2_b"], 2, 1) * s)
    a = _leaky(_ref_conv(a, params["conv3_w"], params["conv3_b"], 2, 1) * s)
    a = _leaky(_ref_conv(a, params["conv4_w"], params["conv4_b"], 2, 1) * s)
    fl = a.reshape(bsz, -1)
    hid = _leaky((fl @ params["linear1_w"].T + params["linear1_b"]) * s)
    mu = hid @ params["latent_mu_w"].T + params["latent_mu_b"]
    logvar = hid @ params["latent_logvar_w"].T + params["latent_logvar_b"]
    z = mu
    d = _leaky(z @ params["lin1d_w"].T + params["lin1d_b"])
    d = _leaky(d @ params["lin_w"].T + params["lin_b"])
    d = d.reshape(bsz, 2 * CONV_LAYERS, H // 16, W // 16)
    d = _leaky(_ref_deconv(d, params["conv5_w"], params["conv5_b"], 2, 1))
    d = _leaky(_ref_deconv(d, params["conv6_w"], params["conv6_b"], 2, 1))
    d = _leaky(_ref_deconv(d, params["conv7_w"], params["conv7_b"], 2, 1))
    d = _leaky(_ref_deconv(d, params["conv8_w"], params["conv8_b"], 2, 1))
    out = jax.nn.sigmoid(_ref_deconv(d, params["output_w"], params["output_b"], 1, 0))
    return out, mu, logvar, z


# -------------------------------- main ----------------------------------------
if __name__ == "__main__":
    key = jax.random.PRNGKey(0)
    pkey, xkey = jax.random.split(key)
    params = init_params(pkey)
    x = jax.random.uniform(xkey, (BATCH, IN_CH, H, W), jnp.float32)

    plan, buffers = build_plan(params)
    fwd = jax.jit(functools.partial(vae_forward, plan))
    out, mu, logvar, z = fwd(buffers, x)
    jax.block_until_ready((out, mu, logvar, z))

    assert out.shape == (BATCH, IN_CH, H, W)
    assert mu.shape == (BATCH, Z_DIM) and logvar.shape == (BATCH, Z_DIM)
    assert z.shape == (BATCH, Z_DIM)

    # Validate the fused Pallas kernel against a pure-JAX/XLA reference
    # (bf16 MXU operands vs f32 reference -> loose tolerance).
    ref_out, ref_mu, ref_logvar, _ = jax.jit(
        functools.partial(vae_reference, params))(x)
    assert jnp.allclose(out, ref_out, atol=5e-2), float(jnp.max(jnp.abs(out - ref_out)))
    assert jnp.allclose(mu, ref_mu, atol=5e-2), float(jnp.max(jnp.abs(mu - ref_mu)))
    assert jnp.allclose(logvar, ref_logvar, atol=5e-2), float(
        jnp.max(jnp.abs(logvar - ref_logvar)))

    print("KERNEL_OK")
</pallas_src>

<mosaic_0001>
module attributes {stable_mosaic.version = 11 : i64} {
  func.func @_vae_kernel(%arg0: memref<16x192xbf16, #tpu.memory_space<vmem>>, %arg1: memref<1632x128xbf16, #tpu.memory_space<vmem>>, %arg2: memref<512x32xbf16, #tpu.memory_space<vmem>>, %arg3: memref<16x128xf32, #tpu.memory_space<vmem>>, %arg4: memref<32x128xf32, #tpu.memory_space<vmem>>, %arg5: memref<2x32xf32, #tpu.memory_space<vmem>>) attributes {dimension_semantics = [], scalar_prefetch = 0 : i64, scratch_operands = 0 : i64, tpu.core_type = #tpu.core_type<tc>} {
    %c0 = arith.constant 0 : index
    %c0_0 = arith.constant 0 : index
    %0 = vector.load %arg3[%c0, %c0_0] : memref<16x128xf32, #tpu.memory_space<vmem>>, vector<16x128xf32>
    %c0_1 = arith.constant 0 : index
    %c0_2 = arith.constant 0 : index
    %1 = vector.load %arg0[%c0_1, %c0_2] : memref<16x192xbf16, #tpu.memory_space<vmem>>, vector<16x192xbf16>
    %c0_3 = arith.constant 0 : index
    %c0_4 = arith.constant 0 : index
    %2 = vector.load %arg1[%c0_3, %c0_4] : memref<1632x128xbf16, #tpu.memory_space<vmem>>, vector<192x64xbf16>
    %cst = arith.constant dense<0.000000e+00> : vector<16x64xf32>
    %3 = tpu.matmul %1, %2, %cst {dimension_numbers = #tpu.dot_dimension_numbers<[1], [0], [0], [1], [0, 0, 1, 1], [], []>} : vector<16x192xbf16>, vector<192x64xbf16>, vector<16x64xf32> -> vector<16x64xf32>
    %4 = vector.extract_strided_slice %0 {offsets = [0, 0], sizes = [1, 64], strides = [1, 1]} : vector<16x128xf32> to vector<1x64xf32>
    %5 = vector.broadcast %4 : vector<1x64xf32> to vector<16x64xf32>
    %6 = arith.addf %3, %5 : vector<16x64xf32>
    %cst_5 = arith.constant 0.000000e+00 : f32
    %7 = vector.broadcast %cst_5 : f32 to vector<16x64xf32>
    %8 = arith.cmpf ogt, %6, %7 : vector<16x64xf32>
    %cst_6 = arith.constant 1.000000e-01 : f32
    %9 = vector.broadcast %cst_6 : f32 to vector<16x64xf32>
    %10 = arith.mulf %9, %6 : vector<16x64xf32>
    %11 = arith.select %8, %6, %10 : vector<16x64xi1>, vector<16x64xf32>
    %12 = arith.truncf %11 : vector<16x64xf32> to vector<16x64xbf16>
    %c0_7 = arith.constant 0 : index
    %c0_8 = arith.constant 0 : index
    %13 = vector.load %arg2[%c0_7, %c0_8] : memref<512x32xbf16, #tpu.memory_space<vmem>>, vector<16x16xbf16>
    %cst_9 = arith.constant dense<0.000000e+00> : vector<16x64xf32>
    %14 = tpu.matmul %13, %12, %cst_9 {dimension_numbers = #tpu.dot_dimension_numbers<[1], [0], [0], [1], [0, 0, 1, 1], [], []>} : vector<16x16xbf16>, vector<16x64xbf16>, vector<16x64xf32> -> vector<16x64xf32>
    %c16 = arith.constant 16 : index
    %c0_10 = arith.constant 0 : index
    %15 = vector.load %arg2[%c16, %c0_10] : memref<512x32xbf16, #tpu.memory_space<vmem>>, vector<16x16xbf16>
    %cst_11 = arith.constant dense<0.000000e+00> : vector<16x64xf32>
    %16 = tpu.matmul %15, %12, %cst_11 {dimension_numbers = #tpu.dot_dimension_numbers<[1], [0], [0], [1], [0, 0, 1, 1], [], []>} : vector<16x16xbf16>, vector<16x64xbf16>, vector<16x64xf32> -> vector<16x64xf32>
    %c32 = arith.constant 32 : index
    %c0_12 = arith.constant 0 : index
    %17 = vector.load %arg2[%c32, %c0_12] : memref<512x32xbf16, #tpu.memory_space<vmem>>, vector<16x16xbf16>
    %cst_13 = arith.constant dense<0.000000e+00> : vector<16x64xf32>
    %18 = tpu.matmul %17, %12, %cst_13 {dimension_numbers = #tpu.dot_dimension_numbers<[1], [0], [0], [1], [0, 0, 1, 1], [], []>} : vector<16x16xbf16>, vector<16x64xbf16>, vector<16x64xf32> -> vector<16x64xf32>
    %c48 = arith.constant 48 : index
    %c0_14 = arith.constant 0 : index
    %19 = vector.load %arg2[%c48, %c0_14] : memref<512x32xbf16, #tpu.memory_space<vmem>>, vector<16x16xbf16>
    %cst_15 = arith.constant dense<0.000000e+00> : vector<16x64xf32>
    %20 = tpu.matmul %19, %12, %cst_15 {dimension_numbers = #tpu.dot_dimension_numbers<[1], [0], [0], [1], [0, 0, 1, 1], [], []>} : vector<16x16xbf16>, vector<16x64xbf16>, vector<16x64xf32> -> vector<16x64xf32>
    %21 = tpu.concatenate %14, %16, %18, %20 in 1 : vector<16x64xf32>, vector<16x64xf32>, vector<16x64xf32>, vector<16x64xf32> -> vector<16x256xf32>
    %c192 = arith.constant 192 : index
    %c0_16 = arith.constant 0 : index
    %22 = vector.load %arg1[%c192, %c0_16] : memref<1632x128xbf16, #tpu.memory_space<vmem>>, vector<256x32xbf16>
    %23 = arith.truncf %21 : vector<16x256xf32> to vector<16x256xbf16>
    %cst_17 = arith.constant dense<0.000000e+00> : vector<16x32xf32>
    %24 = tpu.matmul %23, %22, %cst_17 {dimension_numbers = #tpu.dot_dimension_numbers<[1], [0], [0], [1], [0, 0, 1, 1], [], []>} : vector<16x256xbf16>, vector<256x32xbf16>, vector<16x32xf32> -> vector<16x32xf32>
    %25 = vector.extract_strided_slice %0 {offsets = [1, 0], sizes = [1, 32], strides = [1, 1]} : vector<16x128xf32> to vector<1x32xf32>
    %26 = vector.broadcast %25 : vector<1x32xf32> to vector<16x32xf32>
    %27 = arith.addf %24, %26 : vector<16x32xf32>
    %cst_18 = arith.constant 0.000000e+00 : f32
    %28 = vector.broadcast %cst_18 : f32 to vector<16x32xf32>
    %29 = arith.cmpf ogt, %27, %28 : vector<16x32xf32>
    %cst_19 = arith.constant 1.000000e-01 : f32
    %30 = vector.broadcast %cst_19 : f32 to vector<16x32xf32>
    %31 = arith.mulf %30, %27 : vector<16x32xf32>
    %32 = arith.select %29, %27, %31 : vector<16x32xi1>, vector<16x32xf32>
    %33 = arith.truncf %32 : vector<16x32xf32> to vector<16x32xbf16>
    %c64 = arith.constant 64 : index
    %c0_20 = arith.constant 0 : index
    %34 = vector.load %arg2[%c64, %c0_20] : memref<512x32xbf16, #tpu.memory_space<vmem>>, vector<16x16xbf16>
    %cst_21 = arith.constant dense<0.000000e+00> : vector<16x32xf32>
    %35 = tpu.matmul %34, %33, %cst_21 {dimension_numbers = #tpu.dot_dimension_numbers<[1], [0], [0], [1], [0, 0, 1, 1], [], []>} : vector<16x16xbf16>, vector<16x32xbf16>, vector<16x32xf32> -> vector<16x32xf32>
    %c80 = arith.constant 80 : index
    %c0_22 = arith.constant 0 : index
    %36 = vector.load %arg2[%c80, %c0_22] : memref<512x32xbf16, #tpu.memory_space<vmem>>, vector<16x16xbf16>
    %cst_23 = arith.constant dense<0.000000e+00> : vector<16x32xf32>
    %37 = tpu.matmul %36, %33, %cst_23 {dimension_numbers = #tpu.dot_dimension_numbers<[1], [0], [0], [1], [0, 0, 1, 1], [], []>} : vector<16x16xbf16>, vector<16x32xbf16>, vector<16x32xf32> -> vector<16x32xf32>
    %c96 = arith.constant 96 : index
    %c0_24 = arith.constant 0 : index
    %38 = vector.load %arg2[%c96, %c0_24] : memref<512x32xbf16, #tpu.memory_space<vmem>>, vector<16x16xbf16>
    %cst_25 = arith.constant dense<0.000000e+00> : vector<16x32xf32>
    %39 = tpu.matmul %38, %33, %cst_25 {dimension_numbers = #tpu.dot_dimension_numbers<[1], [0], [0], [1], [0, 0, 1, 1], [], []>} : vector<16x16xbf16>, vector<16x32xbf16>, vector<16x32xf32> -> vector<16x32xf32>
    %c112 = arith.constant 112 : index
    %c0_26 = arith.constant 0 : index
    %40 = vector.load %arg2[%c112, %c0_26] : memref<512x32xbf16, #tpu.memory_space<vmem>>, vector<16x16xbf16>
    %cst_27 = arith.constant dense<0.000000e+00> : vector<16x32xf32>
    %41 = tpu.matmul %40, %33, %cst_27 {dimension_numbers = #tpu.dot_dimension_numbers<[1], [0], [0], [1], [0, 0, 1, 1], [], []>} : vector<16x16xbf16>, vector<16x32xbf16>, vector<16x32xf32> -> vector<16x32xf32>
    %42 = tpu.concatenate %35, %37, %39, %41 in 1 : vector<16x32xf32>, vector<16x32xf32>, vector<16x32xf32>, vector<16x32xf32> -> vector<16x128xf32>
    %c448 = arith.constant 448 : index
    %c0_28 = arith.constant 0 : index
    %43 = vector.load %arg1[%c448, %c0_28] : memref<1632x128xbf16, #tpu.memory_space<vmem>>, vector<128x32xbf16>
    %44 = arith.truncf %42 : vector<16x128xf32> to vector<16x128xbf16>
    %cst_29 = arith.constant dense<0.000000e+00> : vector<16x32xf32>
    %45 = tpu.matmul %44, %43, %cst_29 {dimension_numbers = #tpu.dot_dimension_numbers<[1], [0], [0], [1], [0, 0, 1, 1], [], []>} : vector<16x128xbf16>, vector<128x32xbf16>, vector<16x32xf32> -> vector<16x32xf32>
    %46 = vector.extract_strided_slice %0 {offsets = [2, 0], sizes = [1, 32], strides = [1, 1]} : vector<16x128xf32> to vector<1x32xf32>
    %47 = vector.broadcast %46 : vector<1x32xf32> to vector<16x32xf32>
    %48 = arith.addf %45, %47 : vector<16x32xf32>
    %cst_30 = arith.constant 0.000000e+00 : f32
    %49 = vector.broadcast %cst_30 : f32 to vector<16x32xf32>
    %50 = arith.cmpf ogt, %48, %49 : vector<16x32xf32>
    %cst_31 = arith.constant 1.000000e-01 : f32
    %51 = vector.broadcast %cst_31 : f32 to vector<16x32xf32>
    %52 = arith.mulf %51, %48 : vector<16x32xf32>
    %53 = arith.select %50, %48, %52 : vector<16x32xi1>, vector<16x32xf32>
    %54 = arith.truncf %53 : vector<16x32xf32> to vector<16x32xbf16>
    %c128 = arith.constant 128 : index
    %c0_32 = arith.constant 0 : index
    %55 = vector.load %arg2[%c128, %c0_32] : memref<512x32xbf16, #tpu.memory_space<vmem>>, vector<16x16xbf16>
    %cst_33 = arith.constant dense<0.000000e+00> : vector<16x32xf32>
    %56 = tpu.matmul %55, %54, %cst_33 {dimension_numbers = #tpu.dot_dimension_numbers<[1], [0], [0], [1], [0, 0, 1, 1], [], []>} : vector<16x16xbf16>, vector<16x32xbf16>, vector<16x32xf32> -> vector<16x32xf32>
    %c144 = arith.constant 144 : index
    %c0_34 = arith.constant 0 : index
    %57 = vector.load %arg2[%c144, %c0_34] : memref<512x32xbf16, #tpu.memory_space<vmem>>, vector<16x16xbf16>
    %cst_35 = arith.constant dense<0.000000e+00> : vector<16x32xf32>
    %58 = tpu.matmul %57, %54, %cst_35 {dimension_numbers = #tpu.dot_dimension_numbers<[1], [0], [0], [1], [0, 0, 1, 1], [], []>} : vector<16x16xbf16>, vector<16x32xbf16>, vector<16x32xf32> -> vector<16x32xf32>
    %c160 = arith.constant 160 : index
    %c0_36 = arith.constant 0 : index
    %59 = vector.load %arg2[%c160, %c0_36] : memref<512x32xbf16, #tpu.memory_space<vmem>>, vector<16x16xbf16>
    %cst_37 = arith.constant dense<0.000000e+00> : vector<16x32xf32>
    %60 = tpu.matmul %59, %54, %cst_37 {dimension_numbers = #tpu.dot_dimension_numbers<[1], [0], [0], [1], [0, 0, 1, 1], [], []>} : vector<16x16xbf16>, vector<16x32xbf16>, vector<16x32xf32> -> vector<16x32xf32>
    %c176 = arith.constant 176 : index
    %c0_38 = arith.constant 0 : index
    %61 = vector.load %arg2[%c176, %c0_38] : memref<512x32xbf16, #tpu.memory_space<vmem>>, vector<16x16xbf16>
    %cst_39 = arith.constant dense<0.000000e+00> : vector<16x32xf32>
    %62 = tpu.matmul %61, %54, %cst_39 {dimension_numbers = #tpu.dot_dimension_numbers<[1], [0], [0], [1], [0, 0, 1, 1], [], []>} : vector<16x16xbf16>, vector<16x32xbf16>, vector<16x32xf32> -> vector<16x32xf32>
    %63 = tpu.concatenate %56, %58, %60, %62 in 1 : vector<16x32xf32>, vector<16x32xf32>, vector<16x32xf32>, vector<16x32xf32> -> vector<16x128xf32>
    %c576 = arith.constant 576 : index
    %c0_40 = arith.constant 0 : index
    %64 = vector.load %arg1[%c576, %c0_40] : memref<1632x128xbf16, #tpu.memory_space<vmem>>, vector<128x16xbf16>
    %65 = arith.truncf %63 : vector<16x128xf32> to vector<16x128xbf16>
    %cst_41 = arith.constant dense<0.000000e+00> : vector<16x16xf32>
    %66 = tpu.matmul %65, %64, %cst_41 {dimension_numbers = #tpu.dot_dimension_numbers<[1], [0], [0], [1], [0, 0, 1, 1], [], []>} : vector<16x128xbf16>, vector<128x16xbf16>, vector<16x16xf32> -> vector<16x16xf32>
    %67 = vector.extract_strided_slice %0 {offsets = [3, 0], sizes = [1, 16], strides = [1, 1]} : vector<16x128xf32> to vector<1x16xf32>
    %68 = vector.broadcast %67 : vector<1x16xf32> to vector<16x16xf32>
    %69 = arith.addf %66, %68 : vector<16x16xf32>
    %cst_42 = arith.constant 0.000000e+00 : f32
    %70 = vector.broadcast %cst_42 : f32 to vector<16x16xf32>
    %71 = arith.cmpf ogt, %69, %70 : vector<16x16xf32>
    %cst_43 = arith.constant 1.000000e-01 : f32
    %72 = vector.broadcast %cst_43 : f32 to vector<16x16xf32>
    %73 = arith.mulf %72, %69 : vector<16x16xf32>
    %74 = arith.select %71, %69, %73 : vector<16x16xi1>, vector<16x16xf32>
    %c704 = arith.constant 704 : index
    %c0_44 = arith.constant 0 : index
    %75 = vector.load %arg1[%c704, %c0_44] : memref<1632x128xbf16, #tpu.memory_space<vmem>>, vector<16x32xbf16>
    %76 = arith.truncf %74 : vector<16x16xf32> to vector<16x16xbf16>
    %cst_45 = arith.constant dense<0.000000e+00> : vector<16x32xf32>
    %77 = tpu.matmul %76, %75, %cst_45 {dimension_numbers = #tpu.dot_dimension_numbers<[1], [0], [0], [1], [0, 0, 1, 1], [], []>} : vector<16x16xbf16>, vector<16x32xbf16>, vector<16x32xf32> -> vector<16x32xf32>
    %78 = vector.extract_strided_slice %0 {offsets = [4, 0], sizes = [1, 32], strides = [1, 1]} : vector<16x128xf32> to vector<1x32xf32>
    %79 = vector.broadcast %78 : vector<1x32xf32> to vector<16x32xf32>
    %80 = arith.addf %77, %79 : vector<16x32xf32>
    %cst_46 = arith.constant 0.000000e+00 : f32
    %81 = vector.broadcast %cst_46 : f32 to vector<16x32xf32>
    %82 = arith.cmpf ogt, %80, %81 : vector<16x32xf32>
    %cst_47 = arith.constant 1.000000e-01 : f32
    %83 = vector.broadcast %cst_47 : f32 to vector<16x32xf32>
    %84 = arith.mulf %83, %80 : vector<16x32xf32>
    %85 = arith.select %82, %80, %84 : vector<16x32xi1>, vector<16x32xf32>
    %c720 = arith.constant 720 : index
    %c0_48 = arith.constant 0 : index
    %86 = vector.load %arg1[%c720, %c0_48] : memref<1632x128xbf16, #tpu.memory_space<vmem>>, vector<32x32xbf16>
    %87 = arith.truncf %85 : vector<16x32xf32> to vector<16x32xbf16>
    %cst_49 = arith.constant dense<0.000000e+00> : vector<16x32xf32>
    %88 = tpu.matmul %87, %86, %cst_49 {dimension_numbers = #tpu.dot_dimension_numbers<[1], [0], [0], [1], [0, 0, 1, 1], [], []>} : vector<16x32xbf16>, vector<32x32xbf16>, vector<16x32xf32> -> vector<16x32xf32>
    %89 = vector.extract_strided_slice %0 {offsets = [5, 0], sizes = [1, 32], strides = [1, 1]} : vector<16x128xf32> to vector<1x32xf32>
    %90 = vector.broadcast %89 : vector<1x32xf32> to vector<16x32xf32>
    %91 = arith.addf %88, %90 : vector<16x32xf32>
    %92 = vector.extract_strided_slice %91 {offsets = [0, 0], sizes = [2, 32], strides = [1, 1]} : vector<16x32xf32> to vector<2x32xf32>
    %c0_50 = arith.constant 0 : index
    %c0_51 = arith.constant 0 : index
    %93 = vector.load %arg5[%c0_50, %c0_51] : memref<2x32xf32, #tpu.memory_space<vmem>>, vector<2x32xf32>
    tpu.vector_store %arg5[%c0_50, %c0_51], %92 {strides = array<i32>} : memref<2x32xf32, #tpu.memory_space<vmem>>, vector<2x32xf32>,
    %94 = vector.extract_strided_slice %91 {offsets = [0, 0], sizes = [16, 16], strides = [1, 1]} : vector<16x32xf32> to vector<16x16xf32>
    %c752 = arith.constant 752 : index
    %c0_52 = arith.constant 0 : index
    %95 = vector.load %arg1[%c752, %c0_52] : memref<1632x128xbf16, #tpu.memory_space<vmem>>, vector<16x32xbf16>
    %96 = arith.truncf %94 : vector<16x16xf32> to vector<16x16xbf16>
    %cst_53 = arith.constant dense<0.000000e+00> : vector<16x32xf32>
    %97 = tpu.matmul %96, %95, %cst_53 {dimension_numbers = #tpu.dot_dimension_numbers<[1], [0], [0], [1], [0, 0, 1, 1], [], []>} : vector<16x16xbf16>, vector<16x32xbf16>, vector<16x32xf32> -> vector<16x32xf32>
    %98 = vector.extract_strided_slice %0 {offsets = [6, 0], sizes = [1, 32], strides = [1, 1]} : vector<16x128xf32> to vector<1x32xf32>
    %99 = vector.broadcast %98 : vector<1x32xf32> to vector<16x32xf32>
    %100 = arith.addf %97, %99 : vector<16x32xf32>
    %cst_54 = arith.constant 0.000000e+00 : f32
    %101 = vector.broadcast %cst_54 : f32 to vector<16x32xf32>
    %102 = arith.cmpf ogt, %100, %101 : vector<16x32xf32>
    %cst_55 = arith.constant 1.000000e-01 : f32
    %103 = vector.broadcast %cst_55 : f32 to vector<16x32xf32>
    %104 = arith.mulf %103, %100 : vector<16x32xf32>
    %105 = arith.select %102, %100, %104 : vector<16x32xi1>, vector<16x32xf32>
    %c768 = arith.constant 768 : index
    %c0_56 = arith.constant 0 : index
    %106 = vector.load %arg1[%c768, %c0_56] : memref<1632x128xbf16, #tpu.memory_space<vmem>>, vector<32x16xbf16>
    %107 = arith.truncf %105 : vector<16x32xf32> to vector<16x32xbf16>
    %cst_57 = arith.constant dense<0.000000e+00> : vector<16x16xf32>
    %108 = tpu.matmul %107, %106, %cst_57 {dimension_numbers = #tpu.dot_dimension_numbers<[1], [0], [0], [1], [0, 0, 1, 1], [], []>} : vector<16x32xbf16>, vector<32x16xbf16>, vector<16x16xf32> -> vector<16x16xf32>
    %109 = vector.extract_strided_slice %0 {offsets = [7, 0], sizes = [1, 16], strides = [1, 1]} : vector<16x128xf32> to vector<1x16xf32>
    %110 = vector.broadcast %109 : vector<1x16xf32> to vector<16x16xf32>
    %111 = arith.addf %108, %110 : vector<16x16xf32>
    %cst_58 = arith.constant 0.000000e+00 : f32
    %112 = vector.broadcast %cst_58 : f32 to vector<16x16xf32>
    %113 = arith.cmpf ogt, %111, %112 : vector<16x16xf32>
    %cst_59 = arith.constant 1.000000e-01 : f32
    %114 = vector.broadcast %cst_59 : f32 to vector<16x16xf32>
    %115 = arith.mulf %114, %111 : vector<16x16xf32>
    %116 = arith.select %113, %111, %115 : vector<16x16xi1>, vector<16x16xf32>
    %117 = arith.truncf %116 : vector<16x16xf32> to vector<16x16xbf16>
    %c192_60 = arith.constant 192 : index
    %c0_61 = arith.constant 0 : index
    %118 = vector.load %arg2[%c192_60, %c0_61] : memref<512x32xbf16, #tpu.memory_space<vmem>>, vector<16x16xbf16>
    %cst_62 = arith.constant dense<0.000000e+00> : vector<16x16xf32>
    %119 = tpu.matmul %118, %117, %cst_62 {dimension_numbers = #tpu.dot_dimension_numbers<[1], [0], [0], [1], [0, 0, 1, 1], [], []>} : vector<16x16xbf16>, vector<16x16xbf16>, vector<16x16xf32> -> vector<16x16xf32>
    %c208 = arith.constant 208 : index
    %c0_63 = arith.constant 0 : index
    %120 = vector.load %arg2[%c208, %c0_63] : memref<512x32xbf16, #tpu.memory_space<vmem>>, vector<16x16xbf16>
    %cst_64 = arith.constant dense<0.000000e+00> : vector<16x16xf32>
    %121 = tpu.matmul %120, %117, %cst_64 {dimension_numbers = #tpu.dot_dimension_numbers<[1], [0], [0], [1], [0, 0, 1, 1], [], []>} : vector<16x16xbf16>, vector<16x16xbf16>, vector<16x16xf32> -> vector<16x16xf32>
    %c224 = arith.constant 224 : index
    %c0_65 = arith.constant 0 : index
    %122 = vector.load %arg2[%c224, %c0_65] : memref<512x32xbf16, #tpu.memory_space<vmem>>, vector<16x16xbf16>
    %cst_66 = arith.constant dense<0.000000e+00> : vector<16x16xf32>
    %123 = tpu.matmul %122, %117, %cst_66 {dimension_numbers = #tpu.dot_dimension_numbers<[1], [0], [0], [1], [0, 0, 1, 1], [], []>} : vector<16x16xbf16>, vector<16x16xbf16>, vector<16x16xf32> -> vector<16x16xf32>
    %c240 = arith.constant 240 : index
    %c0_67 = arith.constant 0 : index
    %124 = vector.load %arg2[%c240, %c0_67] : memref<512x32xbf16, #tpu.memory_space<vmem>>, vector<16x16xbf16>
    %cst_68 = arith.constant dense<0.000000e+00> : vector<16x16xf32>
    %125 = tpu.matmul %124, %117, %cst_68 {dimension_numbers = #tpu.dot_dimension_numbers<[1], [0], [0], [1], [0, 0, 1, 1], [], []>} : vector<16x16xbf16>, vector<16x16xbf16>, vector<16x16xf32> -> vector<16x16xf32>
    %126 = tpu.concatenate %119, %121, %123, %125 in 1 : vector<16x16xf32>, vector<16x16xf32>, vector<16x16xf32>, vector<16x16xf32> -> vector<16x64xf32>
    %c800 = arith.constant 800 : index
    %c0_69 = arith.constant 0 : index
    %127 = vector.load %arg1[%c800, %c0_69] : memref<1632x128xbf16, #tpu.memory_space<vmem>>, vector<64x32xbf16>
    %128 = arith.truncf %126 : vector<16x64xf32> to vector<16x64xbf16>
    %cst_70 = arith.constant dense<0.000000e+00> : vector<16x32xf32>
    %129 = tpu.matmul %128, %127, %cst_70 {dimension_numbers = #tpu.dot_dimension_numbers<[1], [0], [0], [1], [0, 0, 1, 1], [], []>} : vector<16x64xbf16>, vector<64x32xbf16>, vector<16x32xf32> -> vector<16x32xf32>
    %130 = vector.extract_strided_slice %0 {offsets = [8, 0], sizes = [1, 32], strides = [1, 1]} : vector<16x128xf32> to vector<1x32xf32>
    %131 = vector.broadcast %130 : vector<1x32xf32> to vector<16x32xf32>
    %132 = arith.addf %129, %131 : vector<16x32xf32>
    %cst_71 = arith.constant 0.000000e+00 : f32
    %133 = vector.broadcast %cst_71 : f32 to vector<16x32xf32>
    %134 = arith.cmpf ogt, %132, %133 : vector<16x32xf32>
    %cst_72 = arith.constant 1.000000e-01 : f32
    %135 = vector.broadcast %cst_72 : f32 to vector<16x32xf32>
    %136 = arith.mulf %135, %132 : vector<16x32xf32>
    %137 = arith.select %134, %132, %136 : vector<16x32xi1>, vector<16x32xf32>
    %138 = arith.truncf %137 : vector<16x32xf32> to vector<16x32xbf16>
    %c256 = arith.constant 256 : index
    %c0_73 = arith.constant 0 : index
    %139 = vector.load %arg2[%c256, %c0_73] : memref<512x32xbf16, #tpu.memory_space<vmem>>, vector<16x16xbf16>
    %cst_74 = arith.constant dense<0.000000e+00> : vector<16x32xf32>
    %140 = tpu.matmul %139, %138, %cst_74 {dimension_numbers = #tpu.dot_dimension_numbers<[1], [0], [0], [1], [0, 0, 1, 1], [], []>} : vector<16x16xbf16>, vector<16x32xbf16>, vector<16x32xf32> -> vector<16x32xf32>
    %c272 = arith.constant 272 : index
    %c0_75 = arith.constant 0 : index
    %141 = vector.load %arg2[%c272, %c0_75] : memref<512x32xbf16, #tpu.memory_space<vmem>>, vector<16x16xbf16>
    %cst_76 = arith.constant dense<0.000000e+00> : vector<16x32xf32>
    %142 = tpu.matmul %141, %138, %cst_76 {dimension_numbers = #tpu.dot_dimension_numbers<[1], [0], [0], [1], [0, 0, 1, 1], [], []>} : vector<16x16xbf16>, vector<16x32xbf16>, vector<16x32xf32> -> vector<16x32xf32>
    %c288 = arith.constant 288 : index
    %c0_77 = arith.constant 0 : index
    %143 = vector.load %arg2[%c288, %c0_77] : memref<512x32xbf16, #tpu.memory_space<vmem>>, vector<16x16xbf16>
    %cst_78 = arith.constant dense<0.000000e+00> : vector<16x32xf32>
    %144 = tpu.matmul %143, %138, %cst_78 {dimension_numbers = #tpu.dot_dimension_numbers<[1], [0], [0], [1], [0, 0, 1, 1], [], []>} : vector<16x16xbf16>, vector<16x32xbf16>, vector<16x32xf32> -> vector<16x32xf32>
    %c304 = arith.constant 304 : index
    %c0_79 = arith.constant 0 : index
    %145 = vector.load %arg2[%c304, %c0_79] : memref<512x32xbf16, #tpu.memory_space<vmem>>, vector<16x16xbf16>
    %cst_80 = arith.constant dense<0.000000e+00> : vector<16x32xf32>
    %146 = tpu.matmul %145, %138, %cst_80 {dimension_numbers = #tpu.dot_dimension_numbers<[1], [0], [0], [1], [0, 0, 1, 1], [], []>} : vector<16x16xbf16>, vector<16x32xbf16>, vector<16x32xf32> -> vector<16x32xf32>
    %147 = tpu.concatenate %140, %142, %144, %146 in 1 : vector<16x32xf32>, vector<16x32xf32>, vector<16x32xf32>, vector<16x32xf32> -> vector<16x128xf32>
    %c864 = arith.constant 864 : index
    %c0_81 = arith.constant 0 : index
    %148 = vector.load %arg1[%c864, %c0_81] : memref<1632x128xbf16, #tpu.memory_space<vmem>>, vector<128x64xbf16>
    %149 = arith.truncf %147 : vector<16x128xf32> to vector<16x128xbf16>
    %cst_82 = arith.constant dense<0.000000e+00> : vector<16x64xf32>
    %150 = tpu.matmul %149, %148, %cst_82 {dimension_numbers = #tpu.dot_dimension_numbers<[1], [0], [0], [1], [0, 0, 1, 1], [], []>} : vector<16x128xbf16>, vector<128x64xbf16>, vector<16x64xf32> -> vector<16x64xf32>
    %151 = vector.extract_strided_slice %0 {offsets = [9, 0], sizes = [1, 64], strides = [1, 1]} : vector<16x128xf32> to vector<1x64xf32>
    %152 = vector.broadcast %151 : vector<1x64xf32> to vector<16x64xf32>
    %153 = arith.addf %150, %152 : vector<16x64xf32>
    %cst_83 = arith.constant 0.000000e+00 : f32
    %154 = vector.broadcast %cst_83 : f32 to vector<16x64xf32>
    %155 = arith.cmpf ogt, %153, %154 : vector<16x64xf32>
    %cst_84 = arith.constant 1.000000e-01 : f32
    %156 = vector.broadcast %cst_84 : f32 to vector<16x64xf32>
    %157 = arith.mulf %156, %153 : vector<16x64xf32>
    %158 = arith.select %155, %153, %157 : vector<16x64xi1>, vector<16x64xf32>
    %159 = arith.truncf %158 : vector<16x64xf32> to vector<16x64xbf16>
    %c320 = arith.constant 320 : index
    %c0_85 = arith.constant 0 : index
    %160 = vector.load %arg2[%c320, %c0_85] : memref<512x32xbf16, #tpu.memory_space<vmem>>, vector<16x16xbf16>
    %cst_86 = arith.constant dense<0.000000e+00> : vector<16x64xf32>
    %161 = tpu.matmul %160, %159, %cst_86 {dimension_numbers = #tpu.dot_dimension_numbers<[1], [0], [0], [1], [0, 0, 1, 1], [], []>} : vector<16x16xbf16>, vector<16x64xbf16>, vector<16x64xf32> -> vector<16x64xf32>
    %c336 = arith.constant 336 : index
    %c0_87 = arith.constant 0 : index
    %162 = vector.load %arg2[%c336, %c0_87] : memref<512x32xbf16, #tpu.memory_space<vmem>>, vector<16x16xbf16>
    %cst_88 = arith.constant dense<0.000000e+00> : vector<16x64xf32>
    %163 = tpu.matmul %162, %159, %cst_88 {dimension_numbers = #tpu.dot_dimension_numbers<[1], [0], [0], [1], [0, 0, 1, 1], [], []>} : vector<16x16xbf16>, vector<16x64xbf16>, vector<16x64xf32> -> vector<16x64xf32>
    %c352 = arith.constant 352 : index
    %c0_89 = arith.constant 0 : index
    %164 = vector.load %arg2[%c352, %c0_89] : memref<512x32xbf16, #tpu.memory_space<vmem>>, vector<16x16xbf16>
    %cst_90 = arith.constant dense<0.000000e+00> : vector<16x64xf32>
    %165 = tpu.matmul %164, %159, %cst_90 {dimension_numbers = #tpu.dot_dimension_numbers<[1], [0], [0], [1], [0, 0, 1, 1], [], []>} : vector<16x16xbf16>, vector<16x64xbf16>, vector<16x64xf32> -> vector<16x64xf32>
    %c368 = arith.constant 368 : index
    %c0_91 = arith.constant 0 : index
    %166 = vector.load %arg2[%c368, %c0_91] : memref<512x32xbf16, #tpu.memory_space<vmem>>, vector<16x16xbf16>
    %cst_92 = arith.constant dense<0.000000e+00> : vector<16x64xf32>
    %167 = tpu.matmul %166, %159, %cst_92 {dimension_numbers = #tpu.dot_dimension_numbers<[1], [0], [0], [1], [0, 0, 1, 1], [], []>} : vector<16x16xbf16>, vector<16x64xbf16>, vector<16x64xf32> -> vector<16x64xf32>
    %168 = tpu.concatenate %161, %163, %165, %167 in 1 : vector<16x64xf32>, vector<16x64xf32>, vector<16x64xf32>, vector<16x64xf32> -> vector<16x256xf32>
    %c992 = arith.constant 992 : index
    %c0_93 = arith.constant 0 : index
    %169 = vector.load %arg1[%c992, %c0_93] : memref<1632x128xbf16, #tpu.memory_space<vmem>>, vector<256x64xbf16>
    %170 = arith.truncf %168 : vector<16x256xf32> to vector<16x256xbf16>
    %cst_94 = arith.constant dense<0.000000e+00> : vector<16x64xf32>
    %171 = tpu.matmul %170, %169, %cst_94 {dimension_numbers = #tpu.dot_dimension_numbers<[1], [0], [0], [1], [0, 0, 1, 1], [], []>} : vector<16x256xbf16>, vector<256x64xbf16>, vector<16x64xf32> -> vector<16x64xf32>
    %172 = vector.extract_strided_slice %0 {offsets = [10, 0], sizes = [1, 64], strides = [1, 1]} : vector<16x128xf32> to vector<1x64xf32>
    %173 = vector.broadcast %172 : vector<1x64xf32> to vector<16x64xf32>
    %174 = arith.addf %171, %173 : vector<16x64xf32>
    %cst_95 = arith.constant 0.000000e+00 : f32
    %175 = vector.broadcast %cst_95 : f32 to vector<16x64xf32>
    %176 = arith.cmpf ogt, %174, %175 : vector<16x64xf32>
    %cst_96 = arith.constant 1.000000e-01 : f32
    %177 = vector.broadcast %cst_96 : f32 to vector<16x64xf32>
    %178 = arith.mulf %177, %174 : vector<16x64xf32>
    %179 = arith.select %176, %174, %178 : vector<16x64xi1>, vector<16x64xf32>
    %180 = arith.truncf %179 : vector<16x64xf32> to vector<16x64xbf16>
    %c384 = arith.constant 384 : index
    %c0_97 = arith.constant 0 : index
    %181 = vector.load %arg2[%c384, %c0_97] : memref<512x32xbf16, #tpu.memory_space<vmem>>, vector<32x16xbf16>
    %cst_98 = arith.constant dense<0.000000e+00> : vector<32x64xf32>
    %182 = tpu.matmul %181, %180, %cst_98 {dimension_numbers = #tpu.dot_dimension_numbers<[1], [0], [0], [1], [0, 0, 1, 1], [], []>} : vector<32x16xbf16>, vector<16x64xbf16>, vector<32x64xf32> -> vector<32x64xf32>
    %c416 = arith.constant 416 : index
    %c0_99 = arith.constant 0 : index
    %183 = vector.load %arg2[%c416, %c0_99] : memref<512x32xbf16, #tpu.memory_space<vmem>>, vector<32x16xbf16>
    %cst_100 = arith.constant dense<0.000000e+00> : vector<32x64xf32>
    %184 = tpu.matmul %183, %180, %cst_100 {dimension_numbers = #tpu.dot_dimension_numbers<[1], [0], [0], [1], [0, 0, 1, 1], [], []>} : vector<32x16xbf16>, vector<16x64xbf16>, vector<32x64xf32> -> vector<32x64xf32>
    %c448_101 = arith.constant 448 : index
    %c0_102 = arith.constant 0 : index
    %185 = vector.load %arg2[%c448_101, %c0_102] : memref<512x32xbf16, #tpu.memory_space<vmem>>, vector<32x16xbf16>
    %cst_103 = arith.constant dense<0.000000e+00> : vector<32x64xf32>
    %186 = tpu.matmul %185, %180, %cst_103 {dimension_numbers = #tpu.dot_dimension_numbers<[1], [0], [0], [1], [0, 0, 1, 1], [], []>} : vector<32x16xbf16>, vector<16x64xbf16>, vector<32x64xf32> -> vector<32x64xf32>
    %c480 = arith.constant 480 : index
    %c0_104 = arith.constant 0 : index
    %187 = vector.load %arg2[%c480, %c0_104] : memref<512x32xbf16, #tpu.memory_space<vmem>>, vector<32x16xbf16>
    %cst_105 = arith.constant dense<0.000000e+00> : vector<32x64xf32>
    %188 = tpu.matmul %187, %180, %cst_105 {dimension_numbers = #tpu.dot_dimension_numbers<[1], [0], [0], [1], [0, 0, 1, 1], [], []>} : vector<32x16xbf16>, vector<16x64xbf16>, vector<32x64xf32> -> vector<32x64xf32>
    %189 = tpu.concatenate %182, %184, %186, %188 in 1 : vector<32x64xf32>, vector<32x64xf32>, vector<32x64xf32>, vector<32x64xf32> -> vector<32x256xf32>
    %c1248 = arith.constant 1248 : index
    %c0_106 = arith.constant 0 : index
    %190 = vector.load %arg1[%c1248, %c0_106] : memref<1632x128xbf16, #tpu.memory_space<vmem>>, vector<256x128xbf16>
    %191 = arith.truncf %189 : vector<32x256xf32> to vector<32x256xbf16>
    %cst_107 = arith.constant dense<0.000000e+00> : vector<32x128xf32>
    %192 = tpu.matmul %191, %190, %cst_107 {dimension_numbers = #tpu.dot_dimension_numbers<[1], [0], [0], [1], [0, 0, 1, 1], [], []>} : vector<32x256xbf16>, vector<256x128xbf16>, vector<32x128xf32> -> vector<32x128xf32>
    %193 = vector.extract_strided_slice %0 {offsets = [11, 0], sizes = [1, 128], strides = [1, 1]} : vector<16x128xf32> to vector<1x128xf32>
    %194 = vector.broadcast %193 : vector<1x128xf32> to vector<32x128xf32>
    %195 = arith.addf %192, %194 : vector<32x128xf32>
    %cst_108 = arith.constant 0.000000e+00 : f32
    %196 = vector.broadcast %cst_108 : f32 to vector<32x128xf32>
    %197 = arith.cmpf ogt, %195, %196 : vector<32x128xf32>
    %cst_109 = arith.constant 1.000000e-01 : f32
    %198 = vector.broadcast %cst_109 : f32 to vector<32x128xf32>
    %199 = arith.mulf %198, %195 : vector<32x128xf32>
    %200 = arith.select %197, %195, %199 : vector<32x128xi1>, vector<32x128xf32>
    %c1504 = arith.constant 1504 : index
    %c0_110 = arith.constant 0 : index
    %201 = vector.load %arg1[%c1504, %c0_110] : memref<1632x128xbf16, #tpu.memory_space<vmem>>, vector<128x128xbf16>
    %202 = arith.truncf %200 : vector<32x128xf32> to vector<32x128xbf16>
    %cst_111 = arith.constant dense<0.000000e+00> : vector<32x128xf32>
    %203 = tpu.matmul %202, %201, %cst_111 {dimension_numbers = #tpu.dot_dimension_numbers<[1], [0], [0], [1], [0, 0, 1, 1], [], []>} : vector<32x128xbf16>, vector<128x128xbf16>, vector<32x128xf32> -> vector<32x128xf32>
    %204 = vector.extract_strided_slice %0 {offsets = [12, 0], sizes = [1, 128], strides = [1, 1]} : vector<16x128xf32> to vector<1x128xf32>
    %205 = vector.broadcast %204 : vector<1x128xf32> to vector<32x128xf32>
    %206 = arith.addf %203, %205 : vector<32x128xf32>
    %207 = arith.negf %206 : vector<32x128xf32>
    %208 = math.exp %207 : vector<32x128xf32>
    %cst_112 = arith.constant 1.000000e+00 : f32
    %209 = vector.broadcast %cst_112 : f32 to vector<32x128xf32>
    %210 = arith.addf %209, %208 : vector<32x128xf32>
    %211 = arith.divf %209, %210 : vector<32x128xf32>
    %c0_113 = arith.constant 0 : index
    %c0_114 = arith.constant 0 : index
    %212 = vector.load %arg4[%c0_113, %c0_114] : memref<32x128xf32, #tpu.memory_space<vmem>>, vector<32x128xf32>
    tpu.vector_store %arg4[%c0_113, %c0_114], %211 {strides = array<i32>} : memref<32x128xf32, #tpu.memory_space<vmem>>, vector<32x128xf32>,
    return
  }
}

</mosaic_0001>

<bundles_post_ra>
// kernel: vae_forward.1
= control target key start
LH: loop header
LB: loop body
LE: loop exit
PB: predicated region body
PF: predicated region fallthrough
CT: control target
= control target key end

     0   :  { %v4219_v0 = vmov 0   ;;  %vm133_vm0 = vcmask 523264   ;;  %v4220_v15 = vmov 0.0   ;;  %vm4221_vm1 = vmmov 0   ;;  %s4222_s11 = smov 64   ;;  %s4223_s10 = smov 32   ;;  %s4955_s1 = inlined_call_operand.vmem [shape: bf16[1632,128], index: 1, kind: input, shape index: {}]   ;;  %s4956_s0 = inlined_call_operand.vmem [shape: bf16[16,192], index: 0, kind: input, shape index: {}]   ;;  %s4957_s2 = inlined_call_operand.vmem [shape: bf16[512,32], index: 2, kind: input, shape index: {}]   ;;  %s4958_s3 = inlined_call_operand.vmem [shape: f32[16,128], index: 3, kind: input, shape index: {}]   ;;  %s4959_s5 = inlined_call_operand.vmem [shape: f32[2,32], index: 5, kind: output, shape index: {1}]   ;;  %s4960_s4 = inlined_call_operand.vmem [shape: f32[32,128], index: 4, kind: output, shape index: {0}]  }
   0x1   :  { %137 = vmatprep.subr.bf16.mxu0 %v4219_v0  ;;  %v4066_v1 = vld [vmem:[%s4955_s1 + $0x38] sm:$0xff]   ;;  %v4067_v2 = vld [vmem:[%s4955_s1 + $0x30] sm:$0xff]   ;;  %v4068_v3 = vld [vmem:[%s4955_s1 + $0x28] sm:$0xff]   ;;  %3670 = vmatprep.subr.bf16.mxu1 %v4220_v15  ;;  %v48_v16 = vlaneseq  ;;  %vm192_vm4 = vcmask 130048   ;;  %s4224_s12 = smov 96   ;;  %vm820_vm7 = vcmask 261120  }
   0x2   :  { %138 = vmatpush1.bf16.msra.mxu0 %v4066_v1  ;;  %v4069_v4 = vld [vmem:[%s4955_s1 + $0x20] sm:$0xff]   ;;  %v4070_v5 = vld [vmem:[%s4955_s1 + $0x18] sm:$0xff]   ;;  %v4071_v7 = vld [vmem:[%s4955_s1 + $0x10] sm:$0xff]   ;;  %3672 = vmatprep.mubr.msk.bf16.mxu1 %vm4221_vm1, %v4220_v15  ;;  %vm825_vm8 = vcmask 785408   ;;  %vm1423_vm15 = vcmask 254976   ;;  %s4225_s20 = smov 16  }
   0x3   :  { %139 = vmatprep.subr.bf16.mxu0 %v4219_v0  ;;  %v4080_v6 = vld [vmem:[%s4956_s0 + $0x4] ss:$8 sps:$4 sm:$0xff]   ;;  %v4074_v10 = vld [vmem:[%s4955_s1 + $0x58] sm:$0xff]   ;;  %v4075_v11 = vld [vmem:[%s4955_s1 + $0x50] sm:$0xff]   ;;  %v4306_v17 = vshrl.u32 %v48_v16, 7 }
   0x4   :  { %3322 = vmatprep.mubr.msk.bf16.mxu0 %vm133_vm0, %v4080_v6  ;;  %v4072_v8 = vld [vmem:[%s4955_s1 + $0x8] sm:$0xff]   ;;  %v4073_v9 = vld [vmem:[%s4955_s1] sm:$0xff]   ;;  %v4083_v34 = vld [vmem:[%s4957_s2 + $0x10] sm:$0xff]  }
   0x5   :  { %v4076_v12 = vld [vmem:[%s4955_s1 + $0x48] sm:$0xff]   ;;  %v4077_v13 = vld [vmem:[%s4955_s1 + $0x40] sm:$0xff]   ;;  %v50_v18 = vsub.s32 0, %v4306_v17  ;;  %v4084_v35 = vld [vmem:[%s4957_s2 + $0x18] sm:$0xff]  }
   0x6   :  { %140 = vmatpush1.bf16.msra.mxu0 %v4067_v2  ;;  %v4078_v14 = vld [vmem:[%s4956_s0] ss:$8 sps:$4 sm:$0xff]   ;;  %v4085_v36 = vld [vmem:[%s4955_s1 + $0xd8] sm:$0xff]   ;;  %v4087_v38 = vld [vmem:[%s4955_s1 + $0xd0] sm:$0xff]   ;;  %s4226_s0 = smov 48  }
   0x7   :  { %141 = vmatprep.subr.bf16.mxu0 %v4219_v0  ;;  %v4312_v19 = vld [vmem:[%s4958_s3] sm:$0xff]  ;;  %v4082_v33 = vld [vmem:[%s4957_s2 + $0x8] sm:$0xff]   ;;  %v4086_v37 = vld [vmem:[%s4955_s1 + $0x98] sm:$0xff]  }
   0x8   :  { %v51_v20 = vrot.slane %v4312_v19, %v50_v18  ;;  %v4081_v32 = vld [vmem:[%s4957_s2] sm:$0xff]   ;;  %v4088_v39 = vld [vmem:[%s4955_s1 + $0x90] sm:$0xff]   ;;  %v4089_v40 = vld [vmem:[%s4955_s1 + $0xc8] sm:$0xff]  }
   0x9   :  { %v4090_v41 = vld [vmem:[%s4955_s1 + $0x88] sm:$0xff]   ;;  %v4091_v42 = vld [vmem:[%s4955_s1 + $0xc0] sm:$0xff]   ;;  %v4093_v44 = vld [vmem:[%s4955_s1 + $0xb8] sm:$0xff]  }
   0xa   :  { %142 = vmatpush1.bf16.msra.mxu0 %v4068_v3  ;;  %v4092_v43 = vld [vmem:[%s4955_s1 + $0x80] sm:$0xff]   ;;  %v4094_v45 = vld [vmem:[%s4955_s1 + $0x78] sm:$0xff]   ;;  %v4095_v46 = vld [vmem:[%s4955_s1 + $0xb0] sm:$0xff]  }
   0xb   :  { %143 = vmatprep.subr.bf16.mxu0 %v4219_v0  ;;  %v4096_v47 = vld [vmem:[%s4955_s1 + $0x70] sm:$0xff]   ;;  %v4097_v58 = vld [vmem:[%s4955_s1 + $0xa8] sm:$0xff]   ;;  %v4099_v62 = vld [vmem:[%s4955_s1 + $0xa0] sm:$0xff]  }
   0xc   :  { %v4098_v59 = vld [vmem:[%s4955_s1 + $0x68] sm:$0xff]   ;;  %v4100_v63 = vld [vmem:[%s4955_s1 + $0x60] sm:$0xff]  }
   0xe   :  { %144 = vmatpush1.bf16.msra.mxu0 %v4069_v4 }
   0xf   :  { %145 = vmatprep.subr.bf16.mxu0 %v4219_v0 }
  0x12   :  { %146 = vmatpush1.bf16.msra.mxu0 %v4070_v5 }
  0x13   :  { %147 = vmatprep.subr.bf16.mxu0 %v4219_v0 }
  0x16   :  { %148 = vmatpush1.bf16.msra.mxu0 %v4071_v7 }
  0x17   :  { %149 = vmatprep.subr.bf16.mxu0 %v4219_v0 }
  0x1a   :  { %150 = vmatpush1.bf16.msra.mxu0 %v4072_v8 }
  0x1b   :  { %151 = vmatprep.subr.bf16.mxu0 %v4219_v0 }
  0x1e   :  { %152 = vmatpush1.bf16.msra.mxu0 %v4073_v9 }
  0x1f   :  { %161 = vmatprep.subr.bf16.mxu0 %v4219_v0 }
  0x22   :  { %162 = vmatpush2.bf16.msra.mxu0 %v4074_v10 }
  0x23   :  { %163 = vmatprep.subr.bf16.mxu0 %v4219_v0 }
  0x26   :  { %164 = vmatpush2.bf16.msra.mxu0 %v4075_v11 }
  0x27   :  { %165 = vmatprep.subr.bf16.mxu0 %v4219_v0 }
  0x2a   :  { %166 = vmatpush2.bf16.msra.mxu0 %v4076_v12 }
  0x2b   :  { %167 = vmatprep.subr.bf16.mxu0 %v4219_v0 }
  0x2e   :  { %168 = vmatpush2.bf16.msra.mxu0 %v4077_v13 }
  0x2f   :  { %3694 = vmatprep.subr.bf16.mxu0 %v4220_v15 }
  0x31   :  { %170 = vmatmul.mubr.bf16.vlgmr.msra.gmra.mxu0 %v4078_v14 }
  0x32   :  { %3696 = vmatprep.mubr.msk.bf16.mxu0 %vm4221_vm1, %v4220_v15 }
  0xf1   :  { %v171_v21 = vpop.f32.mrf.mxu0 }
  0xf2   :  { %v172_v22 = vadd.f32 %v171_v21, %v51_v20 }
  0xf3   :  { %v173_v23 = vpop.f32.mrf.mxu0 }
  0xf4   :  { %v180_v25 = vmul.f32 0.1, %v172_v22  ;;  %vm178_vm2 = vcmp.gt.f32.partialorder %v172_v22, 0.0 }
  0xf5   :  { %v174_v24 = vpop.f32.mrf.mxu0 }
  0xf6   :  { %v175_v26 = vadd.f32 %v174_v24, %v51_v20  ;;  %v182_v29 = vsel %vm178_vm2, %v172_v22, %v180_v25  ;;  %v446_v22 = vsub.s32 1, %v4306_v17 }
  0xf7   :  { %v176_v27 = vpop.f32.mrf.mxu0 }
  0xf8   :  { %vm179_vm3 = vcmp.gt.f32.partialorder %v175_v26, 0.0  ;;  %v181_v28 = vmul.f32 0.1, %v175_v26  ;;  %v447_v24 = vrot.slane %v4312_v19, %v446_v22 }
  0xfa   :  { %v183_v30 = vsel %vm179_vm3, %v175_v26, %v181_v28 }
  0xfb   :  { %v184_v31 = vpack.c.bf16 %v183_v30, %v182_v29 }
  0xfd   :  { %3671 = vmatpush3.bf16.msra.mxu1 %v184_v31 }
  0xfe   :  { %3676 = vmatprep.subr.bf16.mxu1 %v4220_v15 }
 0x100   :  { %3673 = vmatmul.mubr.msk.bf16.vlgmr.msra.gmra.mxu1 %vm192_vm4, %v4081_v32 }
 0x101   :  { %3677 = vmatpush3.bf16.msra.mxu1 %v184_v31  ;;  %3678 = vmatprep.mubr.msk.bf16.mxu1 %vm4221_vm1, %v4220_v15 }
 0x102   :  { %3682 = vmatprep.subr.bf16.mxu1 %v4220_v15 }
 0x108   :  { %3679 = vmatmul.mubr.msk.bf16.vlgmr.msra.gmra.mxu1 %vm192_vm4, %v4082_v33 }
 0x109   :  { %3683 = vmatpush3.bf16.msra.mxu1 %v184_v31  ;;  %3684 = vmatprep.mubr.msk.bf16.mxu1 %vm4221_vm1, %v4220_v15 }
 0x10a   :  { %3688 = vmatprep.subr.bf16.mxu1 %v4220_v15 }
 0x110   :  { %3685 = vmatmul.mubr.msk.bf16.vlgmr.msra.gmra.mxu1 %vm192_vm4, %v4083_v34 }
 0x111   :  { %3689 = vmatpush3.bf16.msra.mxu1 %v184_v31  ;;  %3690 = vmatprep.mubr.msk.bf16.mxu1 %vm4221_vm1, %v4220_v15 }
 0x112   :  { %3494 = vmatprep.subr.bf16.mxu1 %v4085_v36 }
 0x118   :  { %3691 = vmatmul.mubr.msk.bf16.vlgmr.msra.gmra.mxu1 %vm192_vm4, %v4084_v35 }
 0x119   :  { %3495 = vmatpush3.bf16.msra.mxu1 %v4086_v37  ;;  %v4101_v37 = vld [vmem:[%s4957_s2 + $0x20] sm:$0xff]  }
 0x11a   :  { %3496 = vmatprep.subr.bf16.mxu1 %v4087_v38  ;;  %v4103_v38 = vld [vmem:[%s4957_s2 + $0x30] sm:$0xff]  }
 0x11d   :  { %3497 = vmatpush3.bf16.msra.mxu1 %v4088_v39  ;;  %v4102_v39 = vld [vmem:[%s4957_s2 + $0x28] sm:$0xff]  }
 0x11e   :  { %3498 = vmatprep.subr.bf16.mxu1 %v4089_v40  ;;  %v4104_v40 = vld [vmem:[%s4957_s2 + $0x38] sm:$0xff]  }
 0x121   :  { %3499 = vmatpush3.bf16.msra.mxu1 %v4090_v41  ;;  %v4105_v41 = vld [vmem:[%s4955_s1 + $0x118] sm:$0xff]  }
 0x122   :  { %3500 = vmatprep.subr.bf16.mxu1 %v4091_v42  ;;  %v4106_v42 = vld [vmem:[%s4955_s1 + $0x110] sm:$0xff]  }
 0x125   :  { %3501 = vmatpush3.bf16.msra.mxu1 %v4092_v43  ;;  %v4107_v43 = vld [vmem:[%s4955_s1 + $0x108] sm:$0xff]  }
 0x126   :  { %3502 = vmatprep.subr.bf16.mxu1 %v4093_v44  ;;  %v4108_v44 = vld [vmem:[%s4955_s1 + $0x100] sm:$0xff]  }
 0x129   :  { %3503 = vmatpush3.bf16.msra.mxu1 %v4094_v45  ;;  %v4109_v45 = vld [vmem:[%s4955_s1 + $0xf8] sm:$0xff]  }
 0x12a   :  { %3504 = vmatprep.subr.bf16.mxu1 %v4095_v46 }
 0x12d   :  { %3505 = vmatpush3.bf16.msra.mxu1 %v4096_v47 }
 0x12e   :  { %3506 = vmatprep.subr.bf16.mxu1 %v4097_v58  ;;  %v4112_v58 = vld [vmem:[%s4955_s1 + $0xe0] sm:$0xff]  }
 0x131   :  { %3507 = vmatpush3.bf16.msra.mxu1 %v4098_v59 }
 0x132   :  { %3508 = vmatprep.subr.bf16.mxu1 %v4099_v62 }
 0x135   :  { %3509 = vmatpush3.bf16.msra.mxu1 %v4100_v63 }
 0x136   :  { %3706 = vmatprep.subr.bf16.mxu1 %v4220_v15 }
 0x1c0   :  { %v230_v48 = vpop.f32.mrf.mxu1 }
 0x1c2   :  { %v3674_v49 = vpop.f32.mrf.mxu1 }
 0x1c4   :  { %v233_v50 = vpop.f32.mrf.mxu1 }
 0x1c6   :  { %v3675_v51 = vpop.f32.mrf.mxu1 }
 0x1c8   :  { %v281_v52 = vpop.f32.mrf.mxu1 }
 0x1ca   :  { %v3680_v53 = vpop.f32.mrf.mxu1 }
 0x1cc   :  { %v284_v54 = vpop.f32.mrf.mxu1 }
 0x1cd   :  { %v3971_v5 = vpack.i.bf16 %v284_v54, %v281_v52 }
 0x1ce   :  { %v3681_v55 = vpop.f32.mrf.mxu1 }
 0x1cf   :  { %v4111_v55 = vld [vmem:[%s4955_s1 + $0xe8] sm:$0xff]  }
 0x1d0   :  { %v332_v56 = vpop.f32.mrf.mxu1 }
 0x1d2   :  { %v3686_v57 = vpop.f32.mrf.mxu1 }
 0x1d4   :  { %v335_v60 = vpop.f32.mrf.mxu1 }
 0x1d6   :  { %v3687_v61 = vpop.f32.mrf.mxu1 }
 0x1d8   :  { %v383_v0 = vpop.f32.mrf.mxu1 }
 0x1da   :  { %v3692_v1 = vpop.f32.mrf.mxu1 }
 0x1dc   :  { %v386_v2 = vpop.f32.mrf.mxu1 }
 0x1dd   :  { %v3966_v3 = vpack.i.bf16 %v386_v2, %v383_v0 }
 0x1de   :  { %v3693_v4 = vpop.f32.mrf.mxu1 }
 0x1df   :  { %3967 = vrot.lane.b32.xlu0 %v3966_v3, %s4222_s11 }
 0x1e3   :  { %3972 = vrot.lane.b32.xlu0 %v3971_v5, %s4222_s11 }
 0x251   :  { %v3968_v6 = vpop.permute.xlu0 %3967 }
 0x252   :  { %v3970_v7 = vunpack.i.h.bf16 %v3968_v6  ;;  %v3969_v8 = vunpack.i.l.bf16 %v3968_v6 }
 0x254   :  { %v408_v9 = vsel %vm133_vm0, %v332_v56, %v3969_v8  ;;  %v409_v10 = vsel %vm133_vm0, %v335_v60, %v3970_v7 }
 0x255   :  { %v3973_v11 = vpop.permute.xlu0 %3972  ;;  %v443_v12 = vpack.c.bf16 %v409_v10, %v408_v9 }
 0x256   :  { %v3975_v13 = vunpack.i.h.bf16 %v3973_v11  ;;  %v3974_v14 = vunpack.i.l.bf16 %v3973_v11 }
 0x257   :  { %576 = vmatprep.mubr.bf16.mxu1 %v443_v12 }
 0x258   :  { %v407_v16 = vsel %vm133_vm0, %v233_v50, %v3975_v13  ;;  %v406_v20 = vsel %vm133_vm0, %v230_v48, %v3974_v14  ;;  %v4110_v50 = vld [vmem:[%s4955_s1 + $0xf0] sm:$0xff]  }
 0x259   :  { %v442_v21 = vpack.c.bf16 %v407_v16, %v406_v20 }
 0x25b   :  { %577 = vmatmul.mubr.bf16.vlgmr.msra.gmra.mxu1 %v442_v21 }
 0x25c   :  { %3708 = vmatprep.mubr.msk.bf16.mxu1 %vm4221_vm1, %v4220_v15 }
 0x31b   :  { %v3510_v23 = vpop.f32.mrf.mxu1 }
 0x31d   :  { %v3511_v25 = vpop.f32.mrf.mxu1 }
 0x31e   :  { %v3512_v26 = vadd.f32 %v3511_v25, %v3510_v23  ;;  %v847_v25 = vsub.s32 2, %v4306_v17 }
 0x31f   :  { %v3513_v27 = vpop.f32.mrf.mxu1 }
 0x320   :  { %v579_v28 = vadd.f32 %v3512_v26, %v447_v24  ;;  %v848_v26 = vrot.slane %v4312_v19, %v847_v25 }
 0x321   :  { %v3514_v29 = vpop.f32.mrf.mxu1 }
 0x322   :  { %v3515_v30 = vadd.f32 %v3514_v29, %v3513_v27  ;;  %v587_v31 = vmul.f32 0.1, %v579_v28  ;;  %vm585_vm5 = vcmp.gt.f32.partialorder %v579_v28, 0.0 }
 0x324   :  { %v582_v32 = vadd.f32 %v3515_v30, %v447_v24  ;;  %v589_v34 = vsel %vm585_vm5, %v579_v28, %v587_v31 }
 0x326   :  { %vm586_vm6 = vcmp.gt.f32.partialorder %v582_v32, 0.0  ;;  %v588_v33 = vmul.f32 0.1, %v582_v32 }
 0x328   :  { %v590_v35 = vsel %vm586_vm6, %v582_v32, %v588_v33 }
 0x329   :  { %v591_v36 = vpack.c.bf16 %v590_v35, %v589_v34 }
 0x32b   :  { %3695 = vmatpush3.bf16.msra.mxu0 %v591_v36  ;;  %3707 = vmatpush3.bf16.msra.mxu1 %v591_v36 }
 0x32c   :  { %3700 = vmatprep.subr.bf16.mxu0 %v4220_v15  ;;  %3718 = vmatprep.subr.bf16.mxu1 %v4220_v15 }
 0x32e   :  { %3697 = vmatmul.mubr.msk.bf16.vlgmr.msra.gmra.mxu0 %vm192_vm4, %v4101_v37  ;;  %3709 = vmatmul.mubr.msk.bf16.vlgmr.msra.gmra.mxu1 %vm192_vm4, %v4103_v38  ;;  %v4113_v38 = vld [vmem:[%s4957_s2 + $0x40] sm:$0xff]  }
 0x32f   :  { %3701 = vmatpush3.bf16.msra.mxu0 %v591_v36  ;;  %3702 = vmatprep.mubr.msk.bf16.mxu0 %vm4221_vm1, %v4220_v15 }
 0x330   :  { %3712 = vmatprep.subr.bf16.mxu0 %v4220_v15  ;;  %3734 = vmatprep.mubr.msk.bf16.mxu1 %vm4221_vm1, %v4220_v15 }
 0x331   :  { %3719 = vmatpush3.bf16.msra.mxu1 %v4105_v41  ;;  %v4116_v41 = vld [vmem:[%s4957_s2 + $0x58] sm:$0xff]  }
 0x332   :  { %3720 = vmatprep.subr.bf16.mxu1 %v4220_v15 }
 0x335   :  { %3721 = vmatpush3.bf16.msra.mxu1 %v4106_v42  ;;  %v4117_v42 = vld [vmem:[%s4955_s1 + $0x158] sm:$0xff]  }
 0x336   :  { %3703 = vmatmul.mubr.msk.bf16.vlgmr.msra.gmra.mxu0 %vm192_vm4, %v4102_v39  ;;  %3722 = vmatprep.subr.bf16.mxu1 %v4220_v15  ;;  %v4114_v39 = vld [vmem:[%s4957_s2 + $0x48] sm:$0xff]  }
 0x337   :  { %3713 = vmatpush3.bf16.msra.mxu0 %v591_v36  ;;  %3714 = vmatprep.mubr.msk.bf16.mxu0 %vm4221_vm1, %v4220_v15 }
 0x338   :  { %3738 = vmatprep.subr.bf16.mxu0 %v4220_v15 }
 0x339   :  { %3723 = vmatpush3.bf16.msra.mxu1 %v4107_v43  ;;  %v4118_v43 = vld [vmem:[%s4955_s1 + $0x150] sm:$0xff]  }
 0x33a   :  { %3724 = vmatprep.subr.bf16.mxu1 %v4220_v15 }
 0x33d   :  { %3725 = vmatpush3.bf16.msra.mxu1 %v4108_v44  ;;  %v4119_v44 = vld [vmem:[%s4955_s1 + $0x148] sm:$0xff]  }
 0x33e   :  { %3715 = vmatmul.mubr.msk.bf16.vlgmr.msra.gmra.mxu0 %vm192_vm4, %v4104_v40  ;;  %3726 = vmatprep.subr.bf16.mxu1 %v4220_v15  ;;  %v4115_v40 = vld [vmem:[%s4957_s2 + $0x50] sm:$0xff]  }
 0x33f   :  { %3740 = vmatprep.mubr.msk.bf16.mxu0 %vm4221_vm1, %v4220_v15 }
 0x341   :  { %3727 = vmatpush3.bf16.msra.mxu1 %v4109_v45 }
 0x342   :  { %3728 = vmatprep.subr.bf16.mxu1 %v4220_v15 }
 0x345   :  { %3729 = vmatpush3.bf16.msra.mxu1 %v4110_v50 }
 0x346   :  { %3730 = vmatprep.subr.bf16.mxu1 %v4220_v15 }
 0x349   :  { %3731 = vmatpush3.bf16.msra.mxu1 %v4111_v55 }
 0x34a   :  { %3732 = vmatprep.subr.bf16.mxu1 %v4220_v15 }
 0x34d   :  { %3733 = vmatpush3.bf16.msra.mxu1 %v4112_v58 }
 0x34e   :  { %3762 = vmatprep.subr.bf16.mxu1 %v4220_v15 }
 0x3ee   :  { %v636_v46 = vpop.f32.mrf.mxu0  ;;  %v738_v47 = vpop.f32.mrf.mxu1 }
 0x3f0   :  { %v3698_v48 = vpop.f32.mrf.mxu0  ;;  %v3710_v49 = vpop.f32.mrf.mxu1 }
 0x3f1   :  { %v4121_v49 = vld [vmem:[%s4955_s1 + $0x138] sm:$0xff]  }
 0x3f2   :  { %v639_v51 = vpop.f32.mrf.mxu0  ;;  %v741_v52 = vpop.f32.mrf.mxu1 }
 0x3f3   :  { %v3981_v62 = vpack.i.bf16 %v741_v52, %v738_v47  ;;  %v4120_v47 = vld [vmem:[%s4955_s1 + $0x140] sm:$0xff]  }
 0x3f4   :  { %v3699_v53 = vpop.f32.mrf.mxu0  ;;  %v3711_v54 = vpop.f32.mrf.mxu1 }
 0x3f5   :  { %v4122_v53 = vld [vmem:[%s4955_s1 + $0x130] sm:$0xff]  }
 0x3f6   :  { %v687_v56 = vpop.f32.mrf.mxu0 }
 0x3f8   :  { %v3704_v57 = vpop.f32.mrf.mxu0 }
 0x3fa   :  { %v690_v59 = vpop.f32.mrf.mxu0 }
 0x3fb   :  { %v3976_v60 = vpack.i.bf16 %v690_v59, %v687_v56  ;;  %v4123_v56 = vld [vmem:[%s4955_s1 + $0x128] sm:$0xff]  }
 0x3fc   :  { %v3705_v61 = vpop.f32.mrf.mxu0 }
 0x3fd   :  { %3977 = vrot.lane.b32.xlu1 %v3976_v60, %s4223_s10  ;;  %v4124_v60 = vld [vmem:[%s4955_s1 + $0x120] sm:$0xff]  }
 0x3fe   :  { %v789_v63 = vpop.f32.mrf.mxu0 }
 0x400   :  { %v3716_v0 = vpop.f32.mrf.mxu0 }
 0x401   :  { %3982 = vrot.lane.b32.xlu1 %v3981_v62, %s4222_s11 }
 0x402   :  { %v792_v1 = vpop.f32.mrf.mxu0 }
 0x403   :  { %v3986_v2 = vpack.i.bf16 %v792_v1, %v789_v63 }
 0x404   :  { %v3717_v3 = vpop.f32.mrf.mxu0 }
 0x405   :  { %3987 = vrot.lane.b32.xlu0 %v3986_v2, %s4224_s12 }
 0x46f   :  { %v3978_v4 = vpop.permute.xlu1 %3977 }
 0x470   :  { %v3980_v6 = vunpack.i.h.bf16 %v3978_v4  ;;  %v3979_v7 = vunpack.i.l.bf16 %v3978_v4 }
 0x472   :  { %v822_v11 = vsel %vm820_vm7, %v639_v51, %v3980_v6  ;;  %v821_v12 = vsel %vm820_vm7, %v636_v46, %v3979_v7 }
 0x473   :  { %v3983_v5 = vpop.permute.xlu1 %3982 }
 0x474   :  { %v3985_v8 = vunpack.i.h.bf16 %v3983_v5  ;;  %v3984_v9 = vunpack.i.l.bf16 %v3983_v5 }
 0x476   :  { %v823_v16 = vsel %vm133_vm0, %v821_v12, %v3984_v9  ;;  %v824_v20 = vsel %vm133_vm0, %v822_v11, %v3985_v8 }
 0x477   :  { %v3988_v10 = vpop.permute.xlu0 %3987 }
 0x478   :  { %v3990_v13 = vunpack.i.h.bf16 %v3988_v10  ;;  %v3989_v14 = vunpack.i.l.bf16 %v3988_v10 }
 0x47a   :  { %v827_v21 = vsel %vm825_vm8, %v824_v20, %v3990_v13  ;;  %v826_v23 = vsel %vm825_vm8, %v823_v16, %v3989_v14 }
 0x47b   :  { %v844_v24 = vpack.c.bf16 %v827_v21, %v826_v23 }
 0x47d   :  { %3735 = vmatmul.mubr.bf16.vlgmr.msra.gmra.mxu1 %v844_v24 }
 0x47e   :  { %3778 = vmatprep.mubr.msk.bf16.mxu1 %vm4221_vm1, %v4220_v15  ;;  %3763 = vmatpush3.bf16.msra.mxu1 %v4117_v42  ;;  %v4127_v42 = vld [vmem:[%s4955_s1 + $0x168] sm:$0xff]  }
 0x47f   :  { %3764 = vmatprep.subr.bf16.mxu1 %v4220_v15 }
 0x482   :  { %3765 = vmatpush3.bf16.msra.mxu1 %v4118_v43  ;;  %v1300_v43 = vsub.s32 4, %v4306_v17 }
 0x483   :  { %3766 = vmatprep.subr.bf16.mxu1 %v4220_v15 }
 0x486   :  { %3767 = vmatpush3.bf16.msra.mxu1 %v4119_v44  ;;  %v1301_v44 = vrot.slane %v4312_v19, %v1300_v43 }
 0x487   :  { %3768 = vmatprep.subr.bf16.mxu1 %v4220_v15 }
 0x48a   :  { %3769 = vmatpush3.bf16.msra.mxu1 %v4120_v47 }
 0x48b   :  { %3770 = vmatprep.subr.bf16.mxu1 %v4220_v15 }
 0x48e   :  { %3771 = vmatpush3.bf16.msra.mxu1 %v4121_v49 }
 0x48f   :  { %3772 = vmatprep.subr.bf16.mxu1 %v4220_v15 }
 0x492   :  { %3773 = vmatpush3.bf16.msra.mxu1 %v4122_v53 }
 0x493   :  { %3774 = vmatprep.subr.bf16.mxu1 %v4220_v15 }
 0x496   :  { %3775 = vmatpush3.bf16.msra.mxu1 %v4123_v56  ;;  %v4128_v56 = vld [vmem:[%s4955_s1 + $0x178] sm:$0xff]  }
 0x497   :  { %3776 = vmatprep.subr.bf16.mxu1 %v4220_v15 }
 0x49a   :  { %3777 = vmatpush3.bf16.msra.mxu1 %v4124_v60 }
 0x49b   :  { %3810 = vmatprep.subr.bf16.mxu1 %v4220_v15 }
 0x53d   :  { %v931_v27 = vpop.f32.mrf.mxu1 }
 0x53e   :  { %v932_v28 = vadd.f32 %v931_v27, %v848_v26  ;;  %v4125_v27 = vld [vmem:[%s4955_s1 + $0x160] sm:$0xff]  }
 0x53f   :  { %v3736_v29 = vpop.f32.mrf.mxu1 }
 0x540   :  { %v940_v31 = vmul.f32 0.1, %v932_v28  ;;  %vm938_vm9 = vcmp.gt.f32.partialorder %v932_v28, 0.0 }
 0x541   :  { %v934_v30 = vpop.f32.mrf.mxu1 }
 0x542   :  { %v935_v32 = vadd.f32 %v934_v30, %v848_v26  ;;  %v942_v35 = vsel %vm938_vm9, %v932_v28, %v940_v31  ;;  %v1198_v28 = vsub.s32 3, %v4306_v17  ;;  %vm1792_vm9 = vcmask 392192  }
 0x543   :  { %v3737_v33 = vpop.f32.mrf.mxu1 }
 0x544   :  { %vm939_vm10 = vcmp.gt.f32.partialorder %v935_v32, 0.0  ;;  %v941_v34 = vmul.f32 0.1, %v935_v32  ;;  %v1199_v29 = vrot.slane %v4312_v19, %v1198_v28 }
 0x546   :  { %v943_v36 = vsel %vm939_vm10, %v935_v32, %v941_v34 }
 0x547   :  { %v944_v37 = vpack.c.bf16 %v943_v36, %v942_v35 }
 0x549   :  { %3739 = vmatpush3.bf16.msra.mxu0 %v944_v37 }
 0x54a   :  { %3744 = vmatprep.subr.bf16.mxu0 %v4220_v15 }
 0x54c   :  { %3741 = vmatmul.mubr.msk.bf16.vlgmr.msra.gmra.mxu0 %vm192_vm4, %v4113_v38 }
 0x54d   :  { %3745 = vmatpush3.bf16.msra.mxu0 %v944_v37  ;;  %3746 = vmatprep.mubr.msk.bf16.mxu0 %vm4221_vm1, %v4220_v15 }
 0x54e   :  { %3750 = vmatprep.subr.bf16.mxu0 %v4220_v15 }
 0x554   :  { %3747 = vmatmul.mubr.msk.bf16.vlgmr.msra.gmra.mxu0 %vm192_vm4, %v4114_v39 }
 0x555   :  { %3751 = vmatpush3.bf16.msra.mxu0 %v944_v37  ;;  %3752 = vmatprep.mubr.msk.bf16.mxu0 %vm4221_vm1, %v4220_v15 }
 0x556   :  { %3756 = vmatprep.subr.bf16.mxu0 %v4220_v15 }
 0x55c   :  { %3753 = vmatmul.mubr.msk.bf16.vlgmr.msra.gmra.mxu0 %vm192_vm4, %v4115_v40 }
 0x55d   :  { %3757 = vmatpush3.bf16.msra.mxu0 %v944_v37  ;;  %3758 = vmatprep.mubr.msk.bf16.mxu0 %vm4221_vm1, %v4220_v15 }
 0x55e   :  { %3782 = vmatprep.subr.bf16.mxu0 %v4220_v15 }
 0x564   :  { %3759 = vmatmul.mubr.msk.bf16.vlgmr.msra.gmra.mxu0 %vm192_vm4, %v4116_v41  ;;  %v4126_v41 = vld [vmem:[%s4955_s1 + $0x170] sm:$0xff]  }
 0x565   :  { %3784 = vmatprep.mubr.msk.bf16.mxu0 %vm4221_vm1, %v4220_v15  ;;  %3783 = vmatpush3.bf16.msra.mxu0 %v4125_v27 }
 0x566   :  { %3788 = vmatprep.subr.bf16.mxu0 %v4220_v15 }
 0x60c   :  { %v989_v45 = vpop.f32.mrf.mxu0 }
 0x60e   :  { %v3742_v46 = vpop.f32.mrf.mxu0 }
 0x610   :  { %v992_v48 = vpop.f32.mrf.mxu0 }
 0x612   :  { %v3743_v50 = vpop.f32.mrf.mxu0 }
 0x614   :  { %v1040_v51 = vpop.f32.mrf.mxu0 }
 0x616   :  { %v3748_v52 = vpop.f32.mrf.mxu0 }
 0x618   :  { %v1043_v54 = vpop.f32.mrf.mxu0 }
 0x619   :  { %v3991_v55 = vpack.i.bf16 %v1043_v54, %v1040_v51 }
 0x61a   :  { %v3749_v57 = vpop.f32.mrf.mxu0 }
 0x61b   :  { %3992 = vrot.lane.b32.xlu1 %v3991_v55, %s4223_s10  ;;  %v1365_v57 = vsub.s32 5, %v4306_v17 }
 0x61c   :  { %v1091_v58 = vpop.f32.mrf.mxu0 }
 0x61e   :  { %v3754_v59 = vpop.f32.mrf.mxu0 }
 0x620   :  { %v1094_v61 = vpop.f32.mrf.mxu0 }
 0x621   :  { %v3996_v62 = vpack.i.bf16 %v1094_v61, %v1091_v58  ;;  %v1366_v58 = vrot.slane %v4312_v19, %v1365_v57 }
 0x622   :  { %v3755_v63 = vpop.f32.mrf.mxu0 }
 0x623   :  { %3997 = vrot.lane.b32.xlu0 %v3996_v62, %s4222_s11 }
 0x624   :  { %v1142_v0 = vpop.f32.mrf.mxu0 }
 0x626   :  { %v3760_v1 = vpop.f32.mrf.mxu0 }
 0x628   :  { %v1145_v2 = vpop.f32.mrf.mxu0 }
 0x629   :  { %v4001_v3 = vpack.i.bf16 %v1145_v2, %v1142_v0  ;;  %v4129_v2 = vld [vmem:[%s4955_s1 + $0x188] sm:$0xff]  }
 0x62a   :  { %v3761_v4 = vpop.f32.mrf.mxu0 }
 0x62b   :  { %4002 = vrot.lane.b32.xlu1 %v4001_v3, %s4224_s12  ;;  %v4130_v3 = vld [vmem:[%s4955_s1 + $0x180] sm:$0xff]   ;;  %v1430_v4 = vsub.s32 6, %v4306_v17 }
 0x68d   :  { %v3993_v5 = vpop.permute.xlu1 %3992 }
 0x68e   :  { %v3995_v7 = vunpack.i.h.bf16 %v3993_v5  ;;  %v3994_v8 = vunpack.i.l.bf16 %v3993_v5  ;;  %v1431_v5 = vrot.slane %v4312_v19, %v1430_v4 }
 0x690   :  { %v1174_v12 = vsel %vm820_vm7, %v992_v48, %v3995_v7  ;;  %v1173_v13 = vsel %vm820_vm7, %v989_v45, %v3994_v8 }
 0x695   :  { %v3998_v6 = vpop.permute.xlu0 %3997 }
 0x696   :  { %v4000_v9 = vunpack.i.h.bf16 %v3998_v6  ;;  %v3999_v10 = vunpack.i.l.bf16 %v3998_v6 }
 0x698   :  { %v1176_v20 = vsel %vm133_vm0, %v1174_v12, %v4000_v9  ;;  %v1175_v21 = vsel %vm133_vm0, %v1173_v13, %v3999_v10 }
 0x69d   :  { %v4003_v11 = vpop.permute.xlu1 %4002 }
 0x69e   :  { %v4005_v14 = vunpack.i.h.bf16 %v4003_v11  ;;  %v4004_v16 = vunpack.i.l.bf16 %v4003_v11 }
 0x6a0   :  { %v1178_v23 = vsel %vm825_vm8, %v1176_v20, %v4005_v14  ;;  %v1177_v24 = vsel %vm825_vm8, %v1175_v21, %v4004_v16  ;;  %v1495_v21 = vsub.s32 7, %v4306_v17 }
 0x6a1   :  { %v1195_v26 = vpack.c.bf16 %v1178_v23, %v1177_v24 }
 0x6a2   :  { %v1496_v23 = vrot.slane %v4312_v19, %v1495_v21  ;;  %v4132_v19 = vld [vmem:[%s4957_s2 + $0x68] sm:$0xff]  }
 0x6a3   :  { %3779 = vmatmul.mubr.bf16.vlgmr.msra.gmra.mxu1 %v1195_v26 }
 0x6a4   :  { %3812 = vmatprep.mubr.msk.bf16.mxu1 %vm4221_vm1, %v4220_v15 }
 0x763   :  { %v1282_v30 = vpop.f32.mrf.mxu1 }
 0x764   :  { %v1283_v31 = vadd.f32 %v1282_v30, %v1199_v29 }
 0x765   :  { %v3780_v32 = vpop.f32.mrf.mxu1 }
 0x766   :  { %v1291_v34 = vmul.f32 0.1, %v1283_v31  ;;  %vm1289_vm11 = vcmp.gt.f32.partialorder %v1283_v31, 0.0 }
 0x767   :  { %v1285_v33 = vpop.f32.mrf.mxu1 }
 0x768   :  { %v1286_v35 = vadd.f32 %v1285_v33, %v1199_v29  ;;  %v1293_v38 = vsel %vm1289_vm11, %v1283_v31, %v1291_v34 }
 0x769   :  { %v3781_v36 = vpop.f32.mrf.mxu1 }
 0x76a   :  { %vm1290_vm12 = vcmp.gt.f32.partialorder %v1286_v35, 0.0  ;;  %v1292_v37 = vmul.f32 0.1, %v1286_v35 }
 0x76c   :  { %v1294_v39 = vsel %vm1290_vm12, %v1286_v35, %v1292_v37  ;;  %v4131_v37 = vld [vmem:[%s4957_s2 + $0x60] sm:$0xff]  }
 0x76d   :  { %v1297_v40 = vpack.c.bf16 %v1294_v39, %v1293_v38  ;;  %v4133_v38 = vld [vmem:[%s4957_s2 + $0x70] sm:$0xff]   ;;  %v4134_v39 = vld [vmem:[%s4957_s2 + $0x78] sm:$0xff]  }
 0x76f   :  { %3785 = vmatmul.mubr.msk.bf16.vlgmr.msra.gmra.mxu0 %vm192_vm4, %v1297_v40  ;;  %v4135_v40 = vld [vmem:[%s4955_s1 + $0x1a8] sm:$0xff]  }
 0x770   :  { %3792 = vmatprep.mubr.msk.bf16.mxu0 %vm4221_vm1, %v4220_v15  ;;  %3789 = vmatpush3.bf16.msra.mxu0 %v4126_v41  ;;  %v4136_v41 = vld [vmem:[%s4955_s1 + $0x1a0] sm:$0xff]  }
 0x771   :  { %3790 = vmatprep.subr.bf16.mxu0 %v4220_v15 }
 0x774   :  { %3791 = vmatpush3.bf16.msra.mxu0 %v4127_v42  ;;  %v4137_v42 = vld [vmem:[%s4955_s1 + $0x198] sm:$0xff]  }
 0x775   :  { %3796 = vmatprep.subr.bf16.mxu0 %v4220_v15 }
 0x82f   :  { %v1345_v45 = vpop.f32.mrf.mxu0 }
 0x830   :  { %v1346_v46 = vadd.f32 %v1345_v45, %v1301_v44 }
 0x831   :  { %v3786_v47 = vpop.f32.mrf.mxu0 }
 0x832   :  { %v1354_v49 = vmul.f32 0.1, %v1346_v46  ;;  %vm1352_vm13 = vcmp.gt.f32.partialorder %v1346_v46, 0.0 }
 0x833   :  { %v1348_v48 = vpop.f32.mrf.mxu0 }
 0x834   :  { %v1349_v50 = vadd.f32 %v1348_v48, %v1301_v44  ;;  %v1356_v53 = vsel %vm1352_vm13, %v1346_v46, %v1354_v49 }
 0x835   :  { %v3787_v51 = vpop.f32.mrf.mxu0 }
 0x836   :  { %vm1353_vm14 = vcmp.gt.f32.partialorder %v1349_v50, 0.0  ;;  %v1355_v52 = vmul.f32 0.1, %v1349_v50 }
 0x838   :  { %v1357_v54 = vsel %vm1353_vm14, %v1349_v50, %v1355_v52  ;;  %v4138_v50 = vld [vmem:[%s4955_s1 + $0x190] sm:$0xff]  }
 0x839   :  { %v1362_v55 = vpack.c.bf16 %v1357_v54, %v1356_v53 }
 0x83b   :  { %3793 = vmatmul.mubr.msk.bf16.vlgmr.msra.gmra.mxu0 %vm820_vm7, %v1362_v55 }
 0x83c   :  { %3798 = vmatprep.mubr.msk.bf16.mxu0 %vm4221_vm1, %v4220_v15  ;;  %3797 = vmatpush3.bf16.msra.mxu0 %v4128_v56 }
 0x83d   :  { %3802 = vmatprep.subr.bf16.mxu0 %v4220_v15 }
 0x8fb   :  { %v1416_v59 = vpop.f32.mrf.mxu0 }
 0x8fc   :  { %v1417_v60 = vadd.f32 %v1416_v59, %v1366_v58 }
 0x8fd   :  { %v3794_v61 = vpop.f32.mrf.mxu0 }
 0x8fe   :  { %1424 = vst.msk [vmem:[%s4959_s5] sm:$0x3] %vm1423_vm15, %v1417_v60 }
 0x8ff   :  { %v1419_v62 = vpop.f32.mrf.mxu0 }
 0x900   :  { %v1420_v63 = vadd.f32 %v1419_v62, %v1366_v58 }
 0x901   :  { %v3795_v0 = vpop.f32.mrf.mxu0 }
 0x902   :  { %v1427_v1 = vpack.c.bf16 %v1420_v63, %v1417_v60 }
 0x904   :  { %3799 = vmatmul.mubr.msk.bf16.vlgmr.msra.gmra.mxu0 %vm192_vm4, %v1427_v1 }
 0x905   :  { %3806 = vmatprep.mubr.msk.bf16.mxu0 %vm4221_vm1, %v4220_v15  ;;  %3803 = vmatpush3.bf16.msra.mxu0 %v4129_v2 }
 0x906   :  { %3804 = vmatprep.subr.bf16.mxu0 %v4220_v15 }
 0x909   :  { %3805 = vmatpush3.bf16.msra.mxu0 %v4130_v3 }
 0x90a   :  { %3816 = vmatprep.subr.bf16.mxu0 %v4220_v15 }
 0x9c4   :  { %v1475_v6 = vpop.f32.mrf.mxu0 }
 0x9c5   :  { %v1476_v7 = vadd.f32 %v1475_v6, %v1431_v5 }
 0x9c6   :  { %v3800_v8 = vpop.f32.mrf.mxu0 }
 0x9c7   :  { %v1484_v10 = vmul.f32 0.1, %v1476_v7  ;;  %vm1482_vm2 = vcmp.gt.f32.partialorder %v1476_v7, 0.0 }
 0x9c8   :  { %v1478_v9 = vpop.f32.mrf.mxu0 }
 0x9c9   :  { %v1479_v11 = vadd.f32 %v1478_v9, %v1431_v5  ;;  %v1486_v14 = vsel %vm1482_vm2, %v1476_v7, %v1484_v10 }
 0x9ca   :  { %v3801_v12 = vpop.f32.mrf.mxu0 }
 0x9cb   :  { %vm1483_vm3 = vcmp.gt.f32.partialorder %v1479_v11, 0.0  ;;  %v1485_v13 = vmul.f32 0.1, %v1479_v11 }
 0x9cd   :  { %v1487_v16 = vsel %vm1483_vm3, %v1479_v11, %v1485_v13 }
 0x9ce   :  { %v1492_v20 = vpack.c.bf16 %v1487_v16, %v1486_v14 }
 0x9d0   :  { %3807 = vmatmul.mubr.msk.bf16.vlgmr.msra.gmra.mxu0 %vm820_vm7, %v1492_v20  ;;  %v4657_v20 = vld [vmem:[%s4958_s3 + $0x8] sm:$0xff] }
 0x9d1   :  { %3818 = vmatprep.mubr.msk.bf16.mxu0 %vm4221_vm1, %v4220_v15  ;;  %v1807_v21 = vrot.slane %v4657_v20, %v50_v18  ;;  %v4141_v18 = vld [vmem:[%s4957_s2 + $0x90] sm:$0xff]  }
 0xa90   :  { %v1546_v24 = vpop.f32.mrf.mxu0 }
 0xa91   :  { %v1547_v26 = vadd.f32 %v1546_v24, %v1496_v23 }
 0xa92   :  { %v3808_v27 = vpop.f32.mrf.mxu0 }
 0xa93   :  { %v1555_v30 = vmul.f32 0.1, %v1547_v26  ;;  %vm1553_vm5 = vcmp.gt.f32.partialorder %v1547_v26, 0.0 }
 0xa94   :  { %v1549_v29 = vpop.f32.mrf.mxu0 }
 0xa95   :  { %v1550_v31 = vadd.f32 %v1549_v29, %v1496_v23  ;;  %v1557_v34 = vsel %vm1553_vm5, %v1547_v26, %v1555_v30 }
 0xa96   :  { %v3809_v32 = vpop.f32.mrf.mxu0 }
 0xa97   :  { %vm1554_vm6 = vcmp.gt.f32.partialorder %v1550_v31, 0.0  ;;  %v1556_v33 = vmul.f32 0.1, %v1550_v31 }
 0xa99   :  { %v1558_v35 = vsel %vm1554_vm6, %v1550_v31, %v1556_v33 }
 0xa9a   :  { %v1559_v36 = vpack.c.bf16 %v1558_v35, %v1557_v34 }
 0xa9c   :  { %3811 = vmatpush3.bf16.msra.mxu1 %v1559_v36  ;;  %3817 = vmatpush3.bf16.msra.mxu0 %v1559_v36 }
 0xa9d   :  { %3822 = vmatprep.subr.bf16.mxu1 %v4220_v15  ;;  %3828 = vmatprep.subr.bf16.mxu0 %v4220_v15 }
 0xa9f   :  { %3813 = vmatmul.mubr.msk.bf16.vlgmr.msra.gmra.mxu1 %vm192_vm4, %v4131_v37  ;;  %3819 = vmatmul.mubr.msk.bf16.vlgmr.msra.gmra.mxu0 %vm192_vm4, %v4132_v19  ;;  %v4140_v37 = vld [vmem:[%s4957_s2 + $0x88] sm:$0xff]   ;;  %v4142_v19 = vld [vmem:[%s4957_s2 + $0x98] sm:$0xff]  }
 0xaa0   :  { %3823 = vmatpush3.bf16.msra.mxu1 %v1559_v36  ;;  %3829 = vmatpush3.bf16.msra.mxu0 %v1559_v36  ;;  %v4139_v36 = vld [vmem:[%s4957_s2 + $0x80] sm:$0xff]  }
 0xaa1   :  { %3824 = vmatprep.mubr.msk.bf16.mxu1 %vm4221_vm1, %v4220_v15  ;;  %3830 = vmatprep.mubr.msk.bf16.mxu0 %vm4221_vm1, %v4220_v15 }
 0xaa2   :  { %3834 = vmatprep.subr.bf16.mxu1 %v4220_v15  ;;  %3846 = vmatprep.subr.bf16.mxu0 %v4220_v15 }
 0xaa7   :  { %3825 = vmatmul.mubr.msk.bf16.vlgmr.msra.gmra.mxu1 %vm192_vm4, %v4133_v38  ;;  %3831 = vmatmul.mubr.msk.bf16.vlgmr.msra.gmra.mxu0 %vm192_vm4, %v4134_v39  ;;  %v4143_v38 = vld [vmem:[%s4955_s1 + $0x1e8] sm:$0xff]   ;;  %v4144_v39 = vld [vmem:[%s4955_s1 + $0x1e0] sm:$0xff]  }
 0xaa8   :  { %3842 = vmatprep.mubr.msk.bf16.mxu1 %vm4221_vm1, %v4220_v15  ;;  %3848 = vmatprep.mubr.msk.bf16.mxu0 %vm4221_vm1, %v4220_v15 }
 0xaa9   :  { %3835 = vmatpush3.bf16.msra.mxu1 %v4135_v40  ;;  %v4145_v40 = vld [vmem:[%s4955_s1 + $0x1d8] sm:$0xff]  }
 0xaaa   :  { %3836 = vmatprep.subr.bf16.mxu1 %v4220_v15 }
 0xaad   :  { %3837 = vmatpush3.bf16.msra.mxu1 %v4136_v41  ;;  %v4146_v41 = vld [vmem:[%s4955_s1 + $0x1d0] sm:$0xff]  }
 0xaae   :  { %3838 = vmatprep.subr.bf16.mxu1 %v4220_v15 }
 0xab1   :  { %3839 = vmatpush3.bf16.msra.mxu1 %v4137_v42  ;;  %v4147_v42 = vld [vmem:[%s4955_s1 + $0x1c8] sm:$0xff]  }
 0xab2   :  { %3840 = vmatprep.subr.bf16.mxu1 %v4220_v15 }
 0xab5   :  { %3841 = vmatpush3.bf16.msra.mxu1 %v4138_v50 }
 0xab6   :  { %3858 = vmatprep.subr.bf16.mxu1 %v4220_v15 }
 0xb5f   :  { %v1604_v44 = vpop.f32.mrf.mxu1  ;;  %v1655_v45 = vpop.f32.mrf.mxu0 }
 0xb61   :  { %v3814_v46 = vpop.f32.mrf.mxu1  ;;  %v3820_v47 = vpop.f32.mrf.mxu0 }
 0xb63   :  { %v1607_v48 = vpop.f32.mrf.mxu1  ;;  %v1658_v49 = vpop.f32.mrf.mxu0 }
 0xb64   :  { %v4006_v51 = vpack.i.bf16 %v1658_v49, %v1655_v45 }
 0xb65   :  { %v3815_v52 = vpop.f32.mrf.mxu1  ;;  %v3821_v53 = vpop.f32.mrf.mxu0 }
 0xb66   :  { %4007 = vrot.lane.b32.xlu0 %v4006_v51, %s4225_s20  ;;  %v4149_v52 = vld [vmem:[%s4955_s1 + $0x1b8] sm:$0xff]  }
 0xb67   :  { %v1706_v54 = vpop.f32.mrf.mxu1  ;;  %v1757_v55 = vpop.f32.mrf.mxu0 }
 0xb69   :  { %v3826_v56 = vpop.f32.mrf.mxu1  ;;  %v3832_v57 = vpop.f32.mrf.mxu0 }
 0xb6a   :  { %v4150_v57 = vld [vmem:[%s4955_s1 + $0x1b0] sm:$0xff]  }
 0xb6b   :  { %v1709_v58 = vpop.f32.mrf.mxu1  ;;  %v1760_v59 = vpop.f32.mrf.mxu0 }
 0xb6c   :  { %v4011_v60 = vpack.i.bf16 %v1709_v58, %v1706_v54  ;;  %v4016_v61 = vpack.i.bf16 %v1760_v59, %v1757_v55 }
 0xb6d   :  { %v3827_v62 = vpop.f32.mrf.mxu1  ;;  %v3833_v63 = vpop.f32.mrf.mxu0 }
 0xb6e   :  { %4012 = vrot.lane.b32.xlu1 %v4011_v60, %s4223_s10  ;;  %4017 = vrot.lane.b32.xlu0 %v4016_v61, %s4226_s0 }
 0xbd8   :  { %v4008_v0 = vpop.permute.xlu0 %4007 }
 0xbd9   :  { %v4010_v1 = vunpack.i.h.bf16 %v4008_v0  ;;  %v4009_v2 = vunpack.i.l.bf16 %v4008_v0 }
 0xbdb   :  { %v1789_v9 = vsel %vm192_vm4, %v1607_v48, %v4010_v1  ;;  %v1788_v10 = vsel %vm192_vm4, %v1604_v44, %v4009_v2  ;;  %v4148_v48 = vld [vmem:[%s4955_s1 + $0x1c0] sm:$0xff]  }
 0xbe0   :  { %v4013_v3 = vpop.permute.xlu1 %4012  ;;  %v4018_v4 = vpop.permute.xlu0 %4017 }
 0xbe1   :  { %v4015_v5 = vunpack.i.h.bf16 %v4013_v3  ;;  %v4014_v6 = vunpack.i.l.bf16 %v4013_v3  ;;  %v4020_v7 = vunpack.i.h.bf16 %v4018_v4  ;;  %v4019_v8 = vunpack.i.l.bf16 %v4018_v4 }
 0xbe3   :  { %v1790_v11 = vsel %vm820_vm7, %v1788_v10, %v4014_v6  ;;  %v1791_v12 = vsel %vm820_vm7, %v1789_v9, %v4015_v5 }
 0xbe4   :  { %v1794_v13 = vsel %vm1792_vm9, %v1791_v12, %v4020_v7  ;;  %v1793_v14 = vsel %vm1792_vm9, %v1790_v11, %v4019_v8 }
 0xbe5   :  { %v1803_v16 = vpack.c.bf16 %v1794_v13, %v1793_v14 }
 0xbe7   :  { %3843 = vmatmul.mubr.msk.bf16.vlgmr.msra.gmra.mxu1 %vm133_vm0, %v1803_v16 }
 0xbe8   :  { %3860 = vmatprep.mubr.msk.bf16.mxu1 %vm4221_vm1, %v4220_v15 }
 0xca7   :  { %v1869_v23 = vpop.f32.mrf.mxu1 }
 0xca8   :  { %v1870_v24 = vadd.f32 %v1869_v23, %v1807_v21 }
 0xca9   :  { %v3844_v26 = vpop.f32.mrf.mxu1 }
 0xcaa   :  { %v1878_v29 = vmul.f32 0.1, %v1870_v24  ;;  %vm1876_vm10 = vcmp.gt.f32.partialorder %v1870_v24, 0.0 }
 0xcab   :  { %v1872_v27 = vpop.f32.mrf.mxu1 }
 0xcac   :  { %v1873_v30 = vadd.f32 %v1872_v27, %v1807_v21  ;;  %v1880_v33 = vsel %vm1876_vm10, %v1870_v24, %v1878_v29  ;;  %v2137_v24 = vrot.slane %v4657_v20, %v446_v22  ;;  %v4152_v22 = vld [vmem:[%s4957_s2 + $0xa8] sm:$0xff]  }
 0xcad   :  { %v3845_v31 = vpop.f32.mrf.mxu1 }
 0xcae   :  { %vm1877_vm11 = vcmp.gt.f32.partialorder %v1873_v30, 0.0  ;;  %v1879_v32 = vmul.f32 0.1, %v1873_v30 }
 0xcb0   :  { %v1881_v34 = vsel %vm1877_vm11, %v1873_v30, %v1879_v32 }
 0xcb1   :  { %v1882_v35 = vpack.c.bf16 %v1881_v34, %v1880_v33 }
 0xcb3   :  { %3847 = vmatpush3.bf16.msra.mxu0 %v1882_v35  ;;  %3859 = vmatpush3.bf16.msra.mxu1 %v1882_v35 }
 0xcb4   :  { %3852 = vmatprep.subr.bf16.mxu0 %v4220_v15  ;;  %3870 = vmatprep.subr.bf16.mxu1 %v4220_v15 }
 0xcb6   :  { %3849 = vmatmul.mubr.msk.bf16.vlgmr.msra.gmra.mxu0 %vm192_vm4, %v4139_v36  ;;  %3861 = vmatmul.mubr.msk.bf16.vlgmr.msra.gmra.mxu1 %vm192_vm4, %v4141_v18 }
 0xcb7   :  { %3853 = vmatpush3.bf16.msra.mxu0 %v1882_v35  ;;  %3854 = vmatprep.mubr.msk.bf16.mxu0 %vm4221_vm1, %v4220_v15 }
 0xcb8   :  { %3864 = vmatprep.subr.bf16.mxu0 %v4220_v15  ;;  %3886 = vmatprep.mubr.msk.bf16.mxu1 %vm4221_vm1, %v4220_v15 }
 0xcb9   :  { %3871 = vmatpush3.bf16.msra.mxu1 %v4143_v38  ;;  %v4154_v38 = vld [vmem:[%s4957_s2 + $0xb8] sm:$0xff]  }
 0xcba   :  { %3872 = vmatprep.subr.bf16.mxu1 %v4220_v15 }
 0xcbd   :  { %3873 = vmatpush3.bf16.msra.mxu1 %v4144_v39  ;;  %v4155_v39 = vld [vmem:[%s4955_s1 + $0x268] sm:$0xff]  }
 0xcbe   :  { %3855 = vmatmul.mubr.msk.bf16.vlgmr.msra.gmra.mxu0 %vm192_vm4, %v4140_v37  ;;  %3874 = vmatprep.subr.bf16.mxu1 %v4220_v15  ;;  %v4151_v37 = vld [vmem:[%s4957_s2 + $0xa0] sm:$0xff]  }
 0xcbf   :  { %3865 = vmatpush3.bf16.msra.mxu0 %v1882_v35  ;;  %3866 = vmatprep.mubr.msk.bf16.mxu0 %vm4221_vm1, %v4220_v15 }
 0xcc0   :  { %3890 = vmatprep.subr.bf16.mxu0 %v4220_v15 }
 0xcc1   :  { %3875 = vmatpush3.bf16.msra.mxu1 %v4145_v40  ;;  %v4156_v40 = vld [vmem:[%s4955_s1 + $0x228] sm:$0xff]  }
 0xcc2   :  { %3876 = vmatprep.subr.bf16.mxu1 %v4220_v15 }
 0xcc5   :  { %3877 = vmatpush3.bf16.msra.mxu1 %v4146_v41  ;;  %v4157_v41 = vld [vmem:[%s4955_s1 + $0x260] sm:$0xff]  }
 0xcc6   :  { %3867 = vmatmul.mubr.msk.bf16.vlgmr.msra.gmra.mxu0 %vm192_vm4, %v4142_v19  ;;  %3878 = vmatprep.subr.bf16.mxu1 %v4220_v15  ;;  %v4153_v19 = vld [vmem:[%s4957_s2 + $0xb0] sm:$0xff]  }
 0xcc7   :  { %3892 = vmatprep.mubr.msk.bf16.mxu0 %vm4221_vm1, %v4220_v15 }
 0xcc9   :  { %3879 = vmatpush3.bf16.msra.mxu1 %v4147_v42  ;;  %v4159_v42 = vld [vmem:[%s4955_s1 + $0x258] sm:$0xff]  }
 0xcca   :  { %3880 = vmatprep.subr.bf16.mxu1 %v4220_v15 }
 0xccd   :  { %3881 = vmatpush3.bf16.msra.mxu1 %v4148_v48 }
 0xcce   :  { %3882 = vmatprep.subr.bf16.mxu1 %v4220_v15 }
 0xcd1   :  { %3883 = vmatpush3.bf16.msra.mxu1 %v4149_v52  ;;  %v4164_v52 = vld [vmem:[%s4955_s1 + $0x208] sm:$0xff]  }
 0xcd2   :  { %3884 = vmatprep.subr.bf16.mxu1 %v4220_v15 }
 0xcd5   :  { %3885 = vmatpush3.bf16.msra.mxu1 %v4150_v57  ;;  %v4167_v57 = vld [vmem:[%s4955_s1 + $0x238] sm:$0xff]  }
 0xcd6   :  { %3598 = vmatprep.subr.bf16.mxu1 %v4155_v39 }
 0xd76   :  { %v1927_v44 = vpop.f32.mrf.mxu0  ;;  %v2029_v45 = vpop.f32.mrf.mxu1 }
 0xd78   :  { %v3850_v46 = vpop.f32.mrf.mxu0  ;;  %v3862_v47 = vpop.f32.mrf.mxu1 }
 0xd79   :  { %v4161_v47 = vld [vmem:[%s4955_s1 + $0x250] sm:$0xff]  }
 0xd7a   :  { %v1930_v49 = vpop.f32.mrf.mxu0  ;;  %v2032_v50 = vpop.f32.mrf.mxu1 }
 0xd7b   :  { %v4021_v51 = vpack.i.bf16 %v2032_v50, %v2029_v45  ;;  %v4163_v50 = vld [vmem:[%s4955_s1 + $0x248] sm:$0xff]  }
 0xd7c   :  { %v3851_v53 = vpop.f32.mrf.mxu0  ;;  %v3863_v54 = vpop.f32.mrf.mxu1 }
 0xd7d   :  { %4022 = vrot.lane.b32.xlu0 %v4021_v51, %s4222_s11  ;;  %v4165_v53 = vld [vmem:[%s4955_s1 + $0x240] sm:$0xff]  }
 0xd7e   :  { %v1978_v55 = vpop.f32.mrf.mxu0 }
 0xd80   :  { %v3856_v56 = vpop.f32.mrf.mxu0 }
 0xd81   :  { %v4166_v56 = vld [vmem:[%s4955_s1 + $0x200] sm:$0xff]  }
 0xd82   :  { %v1981_v58 = vpop.f32.mrf.mxu0 }
 0xd83   :  { %v4026_v59 = vpack.i.bf16 %v1981_v58, %v1978_v55 }
 0xd84   :  { %v3857_v60 = vpop.f32.mrf.mxu0 }
 0xd85   :  { %4027 = vrot.lane.b32.xlu1 %v4026_v59, %s4223_s10 }
 0xd86   :  { %v2080_v61 = vpop.f32.mrf.mxu0 }
 0xd88   :  { %v3868_v62 = vpop.f32.mrf.mxu0 }
 0xd8a   :  { %v2083_v63 = vpop.f32.mrf.mxu0 }
 0xd8b   :  { %v4031_v0 = vpack.i.bf16 %v2083_v63, %v2080_v61  ;;  %v4168_v61 = vld [vmem:[%s4955_s1 + $0x1f8] sm:$0xff]  }
 0xd8c   :  { %v3869_v1 = vpop.f32.mrf.mxu0 }
 0xd8d   :  { %4032 = vrot.lane.b32.xlu1 %v4031_v0, %s4224_s12  ;;  %v4169_v0 = vld [vmem:[%s4955_s1 + $0x230] sm:$0xff]  }
 0xd8e   :  { %v4170_v1 = vld [vmem:[%s4955_s1 + $0x1f0] sm:$0xff]  }
 0xdef   :  { %v4023_v5 = vpop.permute.xlu0 %4022 }
 0xdf0   :  { %v4025_v6 = vunpack.i.h.bf16 %v4023_v5  ;;  %v4024_v7 = vunpack.i.l.bf16 %v4023_v5 }
 0xdf7   :  { %v4028_v2 = vpop.permute.xlu1 %4027 }
 0xdf8   :  { %v4030_v3 = vunpack.i.h.bf16 %v4028_v2  ;;  %v4029_v4 = vunpack.i.l.bf16 %v4028_v2 }
 0xdfa   :  { %v2112_v8 = vsel %vm820_vm7, %v1930_v49, %v4030_v3  ;;  %v2111_v9 = vsel %vm820_vm7, %v1927_v44, %v4029_v4  ;;  %v4160_v44 = vld [vmem:[%s4955_s1 + $0x218] sm:$0xff]   ;;  %v4162_v49 = vld [vmem:[%s4955_s1 + $0x210] sm:$0xff]  }
 0xdfb   :  { %v2113_v13 = vsel %vm133_vm0, %v2111_v9, %v4024_v7  ;;  %v2114_v14 = vsel %vm133_vm0, %v2112_v8, %v4025_v6 }
 0xdff   :  { %v4033_v10 = vpop.permute.xlu1 %4032 }
 0xe00   :  { %v4035_v11 = vunpack.i.h.bf16 %v4033_v10  ;;  %v4034_v12 = vunpack.i.l.bf16 %v4033_v10 }
 0xe02   :  { %v2116_v16 = vsel %vm825_vm8, %v2114_v14, %v4035_v11  ;;  %v2115_v21 = vsel %vm825_vm8, %v2113_v13, %v4034_v12 }
 0xe03   :  { %v2133_v23 = vpack.c.bf16 %v2116_v16, %v2115_v21 }
 0xe05   :  { %3887 = vmatmul.mubr.bf16.vlgmr.msra.gmra.mxu1 %v2133_v23 }
 0xe06   :  { %3599 = vmatpush3.bf16.msra.mxu1 %v4156_v40 }
 0xe07   :  { %3600 = vmatprep.subr.bf16.mxu1 %v4157_v41  ;;  %v4172_v41 = vld [vmem:[%s4957_s2 + $0xc8] sm:$0xff]  }
 0xec5   :  { %v2220_v26 = vpop.f32.mrf.mxu1 }
 0xec6   :  { %v2221_v27 = vadd.f32 %v2220_v26, %v2137_v24 }
 0xec7   :  { %v3888_v29 = vpop.f32.mrf.mxu1 }
 0xec8   :  { %v2229_v31 = vmul.f32 0.1, %v2221_v27  ;;  %vm2227_vm7 = vcmp.gt.f32.partialorder %v2221_v27, 0.0  ;;  %v4171_v29 = vld [vmem:[%s4957_s2 + $0xc0] sm:$0xff]  }
 0xec9   :  { %v2223_v30 = vpop.f32.mrf.mxu1 }
 0xeca   :  { %v2224_v32 = vadd.f32 %v2223_v30, %v2137_v24  ;;  %v2231_v35 = vsel %vm2227_vm7, %v2221_v27, %v2229_v31  ;;  %v2495_v31 = vrot.slane %v4657_v20, %v847_v25  ;;  %v4173_v25 = vld [vmem:[%s4957_s2 + $0xd0] sm:$0xff]  }
 0xecb   :  { %v3889_v33 = vpop.f32.mrf.mxu1 }
 0xecc   :  { %vm2228_vm12 = vcmp.gt.f32.partialorder %v2224_v32, 0.0  ;;  %v2230_v34 = vmul.f32 0.1, %v2224_v32 }
 0xece   :  { %v2232_v36 = vsel %vm2228_vm12, %v2224_v32, %v2230_v34 }
 0xecf   :  { %v2233_v18 = vpack.c.bf16 %v2232_v36, %v2231_v35 }
 0xed1   :  { %3891 = vmatpush3.bf16.msra.mxu0 %v2233_v18 }
 0xed2   :  { %3896 = vmatprep.subr.bf16.mxu0 %v4220_v15 }
 0xed4   :  { %3893 = vmatmul.mubr.msk.bf16.vlgmr.msra.gmra.mxu0 %vm192_vm4, %v4151_v37 }
 0xed5   :  { %3897 = vmatpush3.bf16.msra.mxu0 %v2233_v18  ;;  %3898 = vmatprep.mubr.msk.bf16.mxu0 %vm4221_vm1, %v4220_v15 }
 0xed6   :  { %3902 = vmatprep.subr.bf16.mxu0 %v4220_v15 }
 0xedc   :  { %3899 = vmatmul.mubr.msk.bf16.vlgmr.msra.gmra.mxu0 %vm192_vm4, %v4152_v22 }
 0xedd   :  { %3903 = vmatpush3.bf16.msra.mxu0 %v2233_v18  ;;  %3904 = vmatprep.mubr.msk.bf16.mxu0 %vm4221_vm1, %v4220_v15 }
 0xede   :  { %3908 = vmatprep.subr.bf16.mxu0 %v4220_v15 }
 0xee4   :  { %3905 = vmatmul.mubr.msk.bf16.vlgmr.msra.gmra.mxu0 %vm192_vm4, %v4153_v19 }
 0xee5   :  { %3909 = vmatpush3.bf16.msra.mxu0 %v2233_v18  ;;  %3910 = vmatprep.mubr.msk.bf16.mxu0 %vm4221_vm1, %v4220_v15  ;;  %v4158_v15 = vld [vmem:[%s4955_s1 + $0x220] sm:$0xff]  }
 0xee6   :  { %3601 = vmatpush3.bf16.msra.mxu1 %v4158_v15  ;;  %v4174_v15 = vld [vmem:[%s4957_s2 + $0xd8] sm:$0xff]  }
 0xee7   :  { %3602 = vmatprep.subr.bf16.mxu1 %v4159_v42  ;;  %v4175_v42 = vld [vmem:[%s4957_s2 + $0xe0] sm:$0xff]  }
 0xeea   :  { %3603 = vmatpush3.bf16.msra.mxu1 %v4160_v44  ;;  %v4176_v44 = vld [vmem:[%s4957_s2 + $0xe8] sm:$0xff]  }
 0xeeb   :  { %3604 = vmatprep.subr.bf16.mxu1 %v4161_v47  ;;  %v4179_v47 = vld [vmem:[%s4955_s1 + $0x2e8] sm:$0xff]  }
 0xeec   :  { %3911 = vmatmul.mubr.msk.bf16.vlgmr.msra.gmra.mxu0 %vm192_vm4, %v4154_v38 }
 0xeed   :  { %3916 = vmatprep.mubr.msk.bf16.mxu0 %vm192_vm4, %v4171_v29 }
 0xeee   :  { %3605 = vmatpush3.bf16.msra.mxu1 %v4162_v49  ;;  %v4181_v49 = vld [vmem:[%s4955_s1 + $0x2e0] sm:$0xff]  }
 0xeef   :  { %3606 = vmatprep.subr.bf16.mxu1 %v4163_v50  ;;  %v4182_v50 = vld [vmem:[%s4955_s1 + $0x2a0] sm:$0xff]  }
 0xef2   :  { %3607 = vmatpush3.bf16.msra.mxu1 %v4164_v52  ;;  %v4184_v52 = vld [vmem:[%s4955_s1 + $0x298] sm:$0xff]  }
 0xef3   :  { %3608 = vmatprep.subr.bf16.mxu1 %v4165_v53 }
 0xef6   :  { %3609 = vmatpush3.bf16.msra.mxu1 %v4166_v56  ;;  %v4185_v56 = vld [vmem:[%s4955_s1 + $0x2d0] sm:$0xff]  }
 0xef7   :  { %3610 = vmatprep.subr.bf16.mxu1 %v4167_v57 }
 0xefa   :  { %3611 = vmatpush3.bf16.msra.mxu1 %v4168_v61  ;;  %v4188_v61 = vld [vmem:[%s4955_s1 + $0x288] sm:$0xff]  }
 0xefb   :  { %3612 = vmatprep.subr.bf16.mxu1 %v4169_v0 }
 0xefe   :  { %3613 = vmatpush3.bf16.msra.mxu1 %v4170_v1  ;;  %v4190_v1 = vld [vmem:[%s4955_s1 + $0x280] sm:$0xff]  }
 0xeff   :  { %3632 = vmatprep.subr.bf16.mxu1 %v4179_v47 }
 0xf94   :  { %v2278_v45 = vpop.f32.mrf.mxu0 }
 0xf96   :  { %v3894_v46 = vpop.f32.mrf.mxu0 }
 0xf97   :  { %v4178_v46 = vld [vmem:[%s4957_s2 + $0xf8] sm:$0xff]  }
 0xf98   :  { %v2281_v48 = vpop.f32.mrf.mxu0 }
 0xf9a   :  { %v3895_v51 = vpop.f32.mrf.mxu0 }
 0xf9b   :  { %v4183_v51 = vld [vmem:[%s4955_s1 + $0x2d8] sm:$0xff]  }
 0xf9c   :  { %v2329_v54 = vpop.f32.mrf.mxu0 }
 0xf9e   :  { %v3900_v55 = vpop.f32.mrf.mxu0 }
 0xfa0   :  { %v2332_v58 = vpop.f32.mrf.mxu0 }
 0xfa1   :  { %v4041_v59 = vpack.i.bf16 %v2332_v58, %v2329_v54  ;;  %v4186_v58 = vld [vmem:[%s4955_s1 + $0x290] sm:$0xff]  }
 0xfa2   :  { %v3901_v60 = vpop.f32.mrf.mxu0 }
 0xfa3   :  { %4042 = vrot.lane.b32.xlu1 %v4041_v59, %s4222_s11  ;;  %v4187_v60 = vld [vmem:[%s4955_s1 + $0x2c8] sm:$0xff]  }
 0xfa4   :  { %v2380_v62 = vpop.f32.mrf.mxu0 }
 0xfa6   :  { %v3906_v63 = vpop.f32.mrf.mxu0 }
 0xfa8   :  { %v2383_v2 = vpop.f32.mrf.mxu0 }
 0xfaa   :  { %v3907_v3 = vpop.f32.mrf.mxu0 }
 0xfac   :  { %v2431_v4 = vpop.f32.mrf.mxu0 }
 0xfae   :  { %v3912_v5 = vpop.f32.mrf.mxu0 }
 0xfb0   :  { %v2434_v6 = vpop.f32.mrf.mxu0 }
 0xfb1   :  { %v4036_v7 = vpack.i.bf16 %v2434_v6, %v2431_v4  ;;  %v4192_v6 = vld [vmem:[%s4955_s1 + $0x278] sm:$0xff]  }
 0xfb2   :  { %v3913_v8 = vpop.f32.mrf.mxu0 }
 0xfb3   :  { %4037 = vrot.lane.b32.xlu0 %v4036_v7, %s4222_s11 }
0x1015   :  { %v4043_v9 = vpop.permute.xlu1 %4042 }
0x1016   :  { %v4045_v10 = vunpack.i.h.bf16 %v4043_v9  ;;  %v4044_v11 = vunpack.i.l.bf16 %v4043_v9 }
0x1018   :  { %v2455_v16 = vsel %vm133_vm0, %v2281_v48, %v4045_v10  ;;  %v2454_v21 = vsel %vm133_vm0, %v2278_v45, %v4044_v11  ;;  %v4177_v45 = vld [vmem:[%s4957_s2 + $0xf0] sm:$0xff]   ;;  %v4180_v48 = vld [vmem:[%s4955_s1 + $0x2a8] sm:$0xff]  }
0x1019   :  { %v2490_v27 = vpack.c.bf16 %v2455_v16, %v2454_v21  ;;  %v4193_v10 = vld [vmem:[%s4955_s1 + $0x2b0] sm:$0xff]  }
0x101a   :  { %v4194_v11 = vld [vmem:[%s4955_s1 + $0x270] sm:$0xff]  }
0x1025   :  { %v4038_v12 = vpop.permute.xlu0 %4037 }
0x1026   :  { %v4040_v13 = vunpack.i.h.bf16 %v4038_v12  ;;  %v4039_v14 = vunpack.i.l.bf16 %v4038_v12 }
0x1028   :  { %v2456_v23 = vsel %vm133_vm0, %v2380_v62, %v4039_v14  ;;  %v2457_v24 = vsel %vm133_vm0, %v2383_v2, %v4040_v13  ;;  %v4189_v62 = vld [vmem:[%s4955_s1 + $0x2c0] sm:$0xff]   ;;  %v4191_v2 = vld [vmem:[%s4955_s1 + $0x2b8] sm:$0xff]  }
0x1029   :  { %v2491_v26 = vpack.c.bf16 %v2457_v24, %v2456_v23  ;;  %v4195_v24 = vld [vmem:[%s4955_s1 + $0x328] sm:$0xff]  }
0x102b   :  { %2624 = vmatprep.mubr.bf16.mxu1 %v2491_v26  ;;  %v4196_v26 = vld [vmem:[%s4955_s1 + $0x320] sm:$0xff]  }
0x102c   :  { %2625 = vmatmul.mubr.bf16.vlgmr.msra.gmra.mxu1 %v2490_v27 }
0x102d   :  { %3633 = vmatpush3.bf16.msra.mxu1 %v4180_v48 }
0x102e   :  { %3634 = vmatprep.subr.bf16.mxu1 %v4181_v49  ;;  %v4197_v49 = vld [vmem:[%s4955_s1 + $0x318] sm:$0xff]  }
0x1031   :  { %3635 = vmatpush3.bf16.msra.mxu1 %v4182_v50  ;;  %v4198_v50 = vld [vmem:[%s4955_s1 + $0x310] sm:$0xff]  }
0x1032   :  { %3636 = vmatprep.subr.bf16.mxu1 %v4183_v51  ;;  %v4199_v51 = vld [vmem:[%s4955_s1 + $0x308] sm:$0xff]  }
0x1035   :  { %3637 = vmatpush3.bf16.msra.mxu1 %v4184_v52  ;;  %v4200_v52 = vld [vmem:[%s4955_s1 + $0x300] sm:$0xff]  }
0x1036   :  { %3638 = vmatprep.subr.bf16.mxu1 %v4185_v56  ;;  %v2995_v56 = vrot.slane %v4657_v20, %v1198_v28 }
0x1039   :  { %3639 = vmatpush3.bf16.msra.mxu1 %v4186_v58 }
0x103a   :  { %3640 = vmatprep.subr.bf16.mxu1 %v4187_v60 }
0x103d   :  { %3641 = vmatpush3.bf16.msra.mxu1 %v4188_v61 }
0x103e   :  { %3642 = vmatprep.subr.bf16.mxu1 %v4189_v62 }
0x1041   :  { %3643 = vmatpush3.bf16.msra.mxu1 %v4190_v1 }
0x1042   :  { %3644 = vmatprep.subr.bf16.mxu1 %v4191_v2 }
0x1045   :  { %3645 = vmatpush3.bf16.msra.mxu1 %v4192_v6 }
0x1046   :  { %3646 = vmatprep.subr.bf16.mxu1 %v4193_v10 }
0x1049   :  { %3647 = vmatpush3.bf16.msra.mxu1 %v4194_v11 }
0x10ec   :  { %v3614_v30 = vpop.f32.mrf.mxu1 }
0x10ee   :  { %v3615_v32 = vpop.f32.mrf.mxu1 }
0x10ef   :  { %v3616_v33 = vadd.f32 %v3615_v32, %v3614_v30 }
0x10f0   :  { %v3617_v34 = vpop.f32.mrf.mxu1 }
0x10f1   :  { %v2627_v35 = vadd.f32 %v3616_v33, %v2495_v31 }
0x10f2   :  { %v3618_v36 = vpop.f32.mrf.mxu1 }
0x10f3   :  { %v3619_v18 = vadd.f32 %v3618_v36, %v3617_v34  ;;  %v2635_v37 = vmul.f32 0.1, %v2627_v35  ;;  %vm2633_vm1 = vcmp.gt.f32.partialorder %v2627_v35, 0.0 }
0x10f5   :  { %v2630_v22 = vadd.f32 %v3619_v18, %v2495_v31  ;;  %v2637_v38 = vsel %vm2633_vm1, %v2627_v35, %v2635_v37 }
0x10f7   :  { %vm2634_vm8 = vcmp.gt.f32.partialorder %v2630_v22, 0.0  ;;  %v2636_v19 = vmul.f32 0.1, %v2630_v22 }
0x10f9   :  { %v2638_v39 = vsel %vm2634_vm8, %v2630_v22, %v2636_v19 }
0x10fa   :  { %v2639_v40 = vpack.c.bf16 %v2638_v39, %v2637_v38 }
0x10fc   :  { %3914 = vmatprep.subr.bf16.mxu0 %v2639_v40 }
0x10fd   :  { %3915 = vmatpush3.bf16.msra.mxu0 %v2639_v40 }
0x10fe   :  { %3920 = vmatprep.subr.bf16.mxu0 %v2639_v40 }
0x1100   :  { %3917 = vmatmul.mubr.msk.bf16.vlgmr.msra.gmra.mxu0 %vm192_vm4, %v4172_v41 }
0x1101   :  { %3921 = vmatpush3.bf16.msra.mxu0 %v2639_v40  ;;  %3922 = vmatprep.mubr.msk.bf16.mxu0 %vm192_vm4, %v4173_v25 }
0x1102   :  { %3926 = vmatprep.subr.bf16.mxu0 %v2639_v40 }
0x1108   :  { %3923 = vmatmul.mubr.msk.bf16.vlgmr.msra.gmra.mxu0 %vm192_vm4, %v4174_v15 }
0x1109   :  { %3927 = vmatpush3.bf16.msra.mxu0 %v2639_v40  ;;  %3928 = vmatprep.mubr.msk.bf16.mxu0 %vm192_vm4, %v4175_v42 }
0x110a   :  { %3932 = vmatprep.subr.bf16.mxu0 %v2639_v40 }
0x1110   :  { %3929 = vmatmul.mubr.msk.bf16.vlgmr.msra.gmra.mxu0 %vm192_vm4, %v4176_v44 }
0x1111   :  { %3933 = vmatpush3.bf16.msra.mxu0 %v2639_v40  ;;  %3934 = vmatprep.mubr.msk.bf16.mxu0 %vm192_vm4, %v4177_v45 }
0x1112   :  { %3938 = vmatprep.subr.bf16.mxu0 %v4195_v24 }
0x1118   :  { %3935 = vmatmul.mubr.msk.bf16.vlgmr.msra.gmra.mxu0 %vm192_vm4, %v4178_v46 }
0x1119   :  { %3939 = vmatpush3.bf16.msra.mxu0 %v4195_v24 }
0x111a   :  { %3940 = vmatprep.subr.bf16.mxu0 %v4196_v26 }
0x111d   :  { %3941 = vmatpush3.bf16.msra.mxu0 %v4196_v26 }
0x111e   :  { %3942 = vmatprep.subr.bf16.mxu0 %v4197_v49 }
0x1121   :  { %3943 = vmatpush3.bf16.msra.mxu0 %v4197_v49 }
0x1122   :  { %3944 = vmatprep.subr.bf16.mxu0 %v4198_v50 }
0x1125   :  { %3945 = vmatpush3.bf16.msra.mxu0 %v4198_v50 }
0x1126   :  { %3946 = vmatprep.subr.bf16.mxu0 %v4199_v51 }
0x1129   :  { %3947 = vmatpush3.bf16.msra.mxu0 %v4199_v51 }
0x112a   :  { %3948 = vmatprep.subr.bf16.mxu0 %v4200_v52 }
0x112d   :  { %3949 = vmatpush3.bf16.msra.mxu0 %v4200_v52 }
0x11c0   :  { %v4865_v53 = vpop.f32.mrf.mxu0 }
0x11c2   :  { %v2694_v54 = vpop.f32.mrf.mxu0 }
0x11c4   :  { %v4867_v55 = vpop.f32.mrf.mxu0 }
0x11c6   :  { %v2697_v57 = vpop.f32.mrf.mxu0 }
0x11c8   :  { %v3924_v59 = vpop.f32.mrf.mxu0 }
0x11ca   :  { %v2763_v63 = vpop.f32.mrf.mxu0 }
0x11cc   :  { %v3925_v0 = vpop.f32.mrf.mxu0 }
0x11cd   :  { %v4061_v8 = vpack.i.bf16 %v3925_v0, %v3924_v59 }
0x11ce   :  { %v2766_v3 = vpop.f32.mrf.mxu0 }
0x11cf   :  { %v4051_v4 = vpack.i.bf16 %v2766_v3, %v2763_v63 }
0x11d0   :  { %v3930_v5 = vpop.f32.mrf.mxu0 }
0x11d1   :  { %4052 = vrot.lane.b32.xlu1 %v4051_v4, %s4222_s11 }
0x11d2   :  { %v2832_v7 = vpop.f32.mrf.mxu0 }
0x11d4   :  { %v3931_v9 = vpop.f32.mrf.mxu0 }
0x11d5   :  { %4062 = vrot.lane.b32.xlu1 %v4061_v8, %s4222_s11 }
0x11d6   :  { %v2835_v12 = vpop.f32.mrf.mxu0 }
0x11d8   :  { %v3936_v13 = vpop.f32.mrf.mxu0 }
0x11da   :  { %v2901_v14 = vpop.f32.mrf.mxu0 }
0x11dc   :  { %v3937_v16 = vpop.f32.mrf.mxu0 }
0x11dd   :  { %v4056_v27 = vpack.i.bf16 %v3937_v16, %v3936_v13 }
0x11de   :  { %v2904_v21 = vpop.f32.mrf.mxu0 }
0x11df   :  { %v4046_v23 = vpack.i.bf16 %v2904_v21, %v2901_v14 }
0x11e1   :  { %4047 = vrot.lane.b32.xlu0 %v4046_v23, %s4222_s11  ;;  %v3174_v23 = vrot.slane %v4657_v20, %v1300_v43 }
0x11e5   :  { %4057 = vrot.lane.b32.xlu0 %v4056_v27, %s4222_s11 }
0x1243   :  { %v4053_v29 = vpop.permute.xlu1 %4052 }
0x1244   :  { %v4055_v30 = vunpack.i.h.bf16 %v4053_v29  ;;  %v4054_v31 = vunpack.i.l.bf16 %v4053_v29 }
0x1246   :  { %v2949_v35 = vsel %vm133_vm0, %v2697_v57, %v4055_v30  ;;  %v2948_v36 = vsel %vm133_vm0, %v2694_v54, %v4054_v31  ;;  %v4202_v54 = vld [vmem:[%s4955_s1 + $0x2f0] sm:$0xff]  }
0x1247   :  { %v4063_v18 = vpop.permute.xlu1 %4062  ;;  %v2988_v39 = vpack.c.bf16 %v2949_v35, %v2948_v36 }
0x1248   :  { %v4065_v25 = vunpack.i.h.bf16 %v4063_v18  ;;  %v4064_v15 = vunpack.i.l.bf16 %v4063_v18 }
0x124a   :  { %v2950_v46 = vsel %vm133_vm0, %v4865_v53, %v4064_v15  ;;  %v2951_v47 = vsel %vm133_vm0, %v4867_v55, %v4065_v25  ;;  %v4201_v53 = vld [vmem:[%s4955_s1 + $0x2f8] sm:$0xff]  }
0x124b   :  { %v2990_v48 = vpack.c.bf16 %v2951_v47, %v2950_v46  ;;  %3950 = vmatprep.subr.bf16.mxu0 %v4201_v53 }
0x124c   :  { %3951 = vmatpush3.bf16.msra.mxu0 %v4201_v53 }
0x124d   :  { %3952 = vmatprep.subr.bf16.mxu0 %v4202_v54 }
0x1250   :  { %3953 = vmatpush3.bf16.msra.mxu0 %v4202_v54 }
0x1253   :  { %v4048_v32 = vpop.permute.xlu0 %4047 }
0x1254   :  { %v4050_v33 = vunpack.i.h.bf16 %v4048_v32  ;;  %v4049_v34 = vunpack.i.l.bf16 %v4048_v32 }
0x1256   :  { %v2952_v37 = vsel %vm133_vm0, %v2832_v7, %v4049_v34  ;;  %v2953_v22 = vsel %vm133_vm0, %v2835_v12, %v4050_v33 }
0x1257   :  { %v4058_v19 = vpop.permute.xlu0 %4057  ;;  %v2989_v38 = vpack.c.bf16 %v2953_v22, %v2952_v37 }
0x1258   :  { %v4060_v40 = vunpack.i.h.bf16 %v4058_v19  ;;  %v4059_v41 = vunpack.i.l.bf16 %v4058_v19 }
0x1259   :  { %3124 = vmatprep.mubr.bf16.mxu1 %v2989_v38 }
0x125a   :  { %3125 = vmatmul.mubr.bf16.vlgmr.msra.gmra.mxu1 %v2988_v39  ;;  %v2954_v42 = vsel %vm133_vm0, %v3930_v5, %v4059_v41  ;;  %v2955_v44 = vsel %vm133_vm0, %v3931_v9, %v4060_v40 }
0x125b   :  { %v2991_v45 = vpack.c.bf16 %v2955_v44, %v2954_v42 }
0x125d   :  { %3132 = vmatprep.mubr.bf16.mxu1 %v2991_v45 }
0x1262   :  { %3133 = vmatmul.mubr.bf16.gmra.mxu1 %v2990_v48 }
0x131a   :  { %v3648_v55 = vpop.f32.mrf.mxu1 }
0x131c   :  { %v3649_v57 = vpop.f32.mrf.mxu1 }
0x131d   :  { %v3650_v58 = vadd.f32 %v3649_v57, %v3648_v55 }
0x131e   :  { %v3651_v59 = vpop.f32.mrf.mxu1 }
0x131f   :  { %v3127_v60 = vadd.f32 %v3650_v58, %v2995_v56 }
0x1320   :  { %v3652_v61 = vpop.f32.mrf.mxu1 }
0x1321   :  { %v3653_v62 = vadd.f32 %v3652_v61, %v3651_v59  ;;  %v3145_v0 = vmul.f32 0.1, %v3127_v60  ;;  %vm3141_vm0 = vcmp.gt.f32.partialorder %v3127_v60, 0.0 }
0x1322   :  { %v3654_v63 = vpop.f32.mrf.mxu1 }
0x1323   :  { %v3130_v1 = vadd.f32 %v3653_v62, %v2995_v56  ;;  %v3149_v7 = vsel %vm3141_vm0, %v3127_v60, %v3145_v0 }
0x1324   :  { %v3655_v2 = vpop.f32.mrf.mxu1 }
0x1325   :  { %vm3142_vm4 = vcmp.gt.f32.partialorder %v3130_v1, 0.0  ;;  %v3146_v3 = vmul.f32 0.1, %v3130_v1  ;;  %v3656_v4 = vadd.f32 %v3655_v2, %v3654_v63 }
0x1326   :  { %v3657_v5 = vpop.f32.mrf.mxu1 }
0x1327   :  { %v3135_v6 = vadd.f32 %v3656_v4, %v2995_v56  ;;  %v3150_v8 = vsel %vm3142_vm4, %v3130_v1, %v3146_v3 }
0x1328   :  { %v3658_v9 = vpop.f32.mrf.mxu1  ;;  %v3169_v28 = vpack.c.bf16 %v3150_v8, %v3149_v7 }
0x1329   :  { %v3659_v10 = vadd.f32 %v3658_v9, %v3657_v5  ;;  %v3147_v11 = vmul.f32 0.1, %v3135_v6  ;;  %vm3143_vm13 = vcmp.gt.f32.partialorder %v3135_v6, 0.0 }
0x132a   :  { %3954 = vmatprep.mubr.bf16.mxu0 %v3169_v28 }
0x132b   :  { %v3138_v12 = vadd.f32 %v3659_v10, %v2995_v56  ;;  %v3151_v14 = vsel %vm3143_vm13, %v3135_v6, %v3147_v11 }
0x132d   :  { %vm3144_vm14 = vcmp.gt.f32.partialorder %v3138_v12, 0.0  ;;  %v3148_v13 = vmul.f32 0.1, %v3138_v12 }
0x132f   :  { %v3152_v16 = vsel %vm3144_vm14, %v3138_v12, %v3148_v13 }
0x1330   :  { %v3170_v21 = vpack.c.bf16 %v3152_v16, %v3151_v14 }
0x1332   :  { %3955 = vmatmul.mubr.bf16.vlgmr.msra.gmra.mxu0 %v3170_v21 }
0x13f2   :  { %v3956_v24 = vpop.f32.mrf.mxu0 }
0x13f3   :  { %v3266_v26 = vadd.f32 %v3956_v24, %v3174_v23 }
0x13f4   :  { %v3257_v27 = vpop.f32.mrf.mxu0 }
0x13f5   :  { %v3484_v29 = vmul.f32 -1.442695, %v3266_v26  ;;  %v3258_v30 = vadd.f32 %v3257_v27, %v3174_v23 }
0x13f6   :  { %v3957_v31 = vpop.f32.mrf.mxu0 }
0x13f7   :  { %4203 = vpow2.f32 %v3484_v29  ;;  %v3482_v32 = vmul.f32 -1.442695, %v3258_v30  ;;  %v3269_v33 = vadd.f32 %v3957_v31, %v3174_v23 }
0x13f8   :  { %v3260_v34 = vpop.f32.mrf.mxu0 }
0x13f9   :  { %4205 = vpow2.f32 %v3482_v32  ;;  %v3485_v35 = vmul.f32 -1.442695, %v3269_v33  ;;  %v3261_v36 = vadd.f32 %v3260_v34, %v3174_v23 }
0x13fb   :  { %4207 = vpow2.f32 %v3485_v35  ;;  %v3483_v18 = vmul.f32 -1.442695, %v3261_v36 }
0x13fd   :  { %4209 = vpow2.f32 %v3483_v18 }
0x1404   :  { %v4204_v37 = vpop.eup %4203 }
0x1405   :  { %v3286_v17 = vadd.f32 1.0, %v4204_v37 }
0x1406   :  { %v4206_v22 = vpop.eup %4205 }
0x1407   :  { %4211 = vrcp.f32 %v3286_v17  ;;  %v3284_v43 = vadd.f32 1.0, %v4206_v22 }
0x1408   :  { %v4208_v20 = vpop.eup %4207 }
0x1409   :  { %4213 = vrcp.f32 %v3284_v43  ;;  %v3287_v19 = vadd.f32 1.0, %v4208_v20 }
0x140a   :  { %v4210_v38 = vpop.eup %4209 }
0x140b   :  { %4215 = vrcp.f32 %v3287_v19  ;;  %v3285_v39 = vadd.f32 1.0, %v4210_v38 }
0x140d   :  { %4217 = vrcp.f32 %v3285_v39 }
0x1414   :  { %v4212_v40 = vpop.eup %4211 }
0x1415   :  { %3298 = vst [vmem:[%s4960_s4 + $0x10] sm:$0xff] %v4212_v40 }
0x1416   :  { %v4214_v41 = vpop.eup %4213 }
0x1417   :  { %3296 = vst [vmem:[%s4960_s4] sm:$0xff] %v4214_v41 }
0x1418   :  { %v4216_v25 = vpop.eup %4215 }
0x1419   :  { %3299 = vst [vmem:[%s4960_s4 + $0x18] sm:$0xff] %v4216_v25 }
0x141a   :  { %v4218_v15 = vpop.eup %4217 }
0x141b   :  { %3297 = vst [vmem:[%s4960_s4 + $0x8] sm:$0xff] %v4218_v15 }

</bundles_post_ra>
